<compile_context>
chip_gen: v5e
topology: v5e:2x2
jax: 0.10.0
libtpu: 0.0.40
codegen_flags: <defaults>
</compile_context>

<pallas_src>
import jax
import jax.numpy as jnp
from jax.experimental import pallas as pl
from jax.experimental.pallas import tpu as pltpu


def classifier_kernel(x_ref, wih_ref, whh_ref, b_lstm_ref, len_ref,
                      wout_ref, bout_ref, tgt_ref,
                      loss_ref, logits_ref,
                      h_ref, c_ref, feats_ref):
    TB = x_ref.shape[0]                 # Tt * B rows, time-major
    B, H = h_ref.shape
    Tt = TB // B
    CPAD = wout_ref.shape[1]

    t_blk = pl.program_id(0)

    @pl.when(t_blk == 0)
    def _init():
        h_ref[...] = jnp.zeros_like(h_ref)
        c_ref[...] = jnp.zeros_like(c_ref)
        feats_ref[...] = jnp.zeros_like(feats_ref)

    # Hoisted input projection: one (Tt*B, D) x (D, 4H) bf16 MXU matmul per
    # time block, with the LSTM bias folded in once (not per timestep).
    gx = jnp.dot(x_ref[...], wih_ref[...],
                 preferred_element_type=jnp.float32) + b_lstm_ref[...]

    whh = whh_ref[...]                  # (H, 4H) bf16, loaded once per block
    last_t = len_ref[...] - 1           # (B, 1) int32, hoisted out of the loop
    t0 = t_blk * Tt

    h = h_ref[...]
    c = c_ref[...]
    feats = feats_ref[...]

    # Statically unrolled recurrence over the time block (PyTorch gate order
    # i, f, g, o). Only h @ W_hh remains inside the sequential chain.
    for tt in range(Tt):
        gates = gx[tt * B:(tt + 1) * B, :] + jnp.dot(
            h.astype(whh.dtype), whh, preferred_element_type=jnp.float32)
        i_g = jax.nn.sigmoid(gates[:, 0 * H:1 * H])
        f_g = jax.nn.sigmoid(gates[:, 1 * H:2 * H])
        g_g = jnp.tanh(gates[:, 2 * H:3 * H])
        o_g = jax.nn.sigmoid(gates[:, 3 * H:4 * H])
        c = f_g * c + i_g * g_g
        h = o_g * jnp.tanh(c)
        # keep the hidden state at each example's last valid timestep
        # (length 0 -> last_t = -1 never matches, feats stays zero, as in ref)
        feats = jnp.where(last_t == (t0 + tt), h, feats)

    h_ref[...] = h
    c_ref[...] = c
    feats_ref[...] = feats

    # Epilogue on the last time block: linear head + cross-entropy (mean).
    @pl.when(t_blk == pl.num_programs(0) - 1)
    def _final():
        logits = jnp.dot(feats.astype(wout_ref.dtype), wout_ref[...],
                         preferred_element_type=jnp.float32) + bout_ref[...]
        logits_ref[...] = logits                      # lane-dense (B, CPAD) store
        m = jnp.max(logits, axis=-1, keepdims=True)
        lse = jnp.log(jnp.sum(jnp.exp(logits - m), axis=-1, keepdims=True)) + m
        class_ids = jax.lax.broadcasted_iota(jnp.int32, (B, CPAD), 1)
        picked = jnp.sum(jnp.where(class_ids == tgt_ref[...], logits, 0.0),
                         axis=-1, keepdims=True)      # (B, 1)
        per_example = lse - picked
        loss_ref[...] = jnp.sum(per_example, axis=0, keepdims=True) * (1.0 / B)


def classifier_forward(x, targets, lengths, params, *, time_block=8):
    """x: (B, T, D) float, targets: (B,) int, lengths: (B,) int."""
    B, T, D = x.shape
    H = params["w_hh"].shape[0]
    G = 4 * H
    C = params["w_out"].shape[1]
    CPAD = pl.cdiv(C, 128) * 128            # lane-dense padded class dim

    if T % time_block != 0:
        time_block = T                      # fall back to a single block
    Tt = time_block
    nt = T // Tt

    # bf16 operands for every MXU matmul; biases and gate math stay f32.
    # Time-major flatten so each grid step gets a plain 2-D (Tt*B, D) block.
    x_tm = jnp.transpose(x.astype(jnp.bfloat16), (1, 0, 2)).reshape(T * B, D)
    w_ih = params["w_ih"].astype(jnp.bfloat16)
    w_hh = params["w_hh"].astype(jnp.bfloat16)
    b_lstm = params["b_lstm"].astype(jnp.float32)
    # Pad the output head to a full 128-lane tile; padded columns get a very
    # negative bias so they vanish from the softmax / cross-entropy.
    w_out = jnp.zeros((H, CPAD), jnp.bfloat16).at[:, :C].set(
        params["w_out"].astype(jnp.bfloat16))
    b_out = jnp.full((1, CPAD), -1e9, jnp.float32).at[:, :C].set(
        params["b_out"].astype(jnp.float32))

    len2 = lengths.astype(jnp.int32).reshape(B, 1)
    tgt2 = targets.astype(jnp.int32).reshape(B, 1)

    grid_spec = pltpu.PrefetchScalarGridSpec(
        num_scalar_prefetch=0,
        grid=(nt,),
        in_specs=[
            pl.BlockSpec((Tt * B, D), lambda k: (k, 0)),    # x, streamed over T
            pl.BlockSpec((D, G), lambda k: (0, 0)),         # W_ih
            pl.BlockSpec((H, G), lambda k: (0, 0)),         # W_hh
            pl.BlockSpec((1, G), lambda k: (0, 0)),         # b_ih + b_hh
            pl.BlockSpec((B, 1), lambda k: (0, 0)),         # lengths
            pl.BlockSpec((H, CPAD), lambda k: (0, 0)),      # W_out (padded)
            pl.BlockSpec((1, CPAD), lambda k: (0, 0)),      # b_out (padded)
            pl.BlockSpec((B, 1), lambda k: (0, 0)),         # targets
        ],
        out_specs=(
            pl.BlockSpec((1, 1), lambda k: (0, 0)),         # loss
            pl.BlockSpec((B, CPAD), lambda k: (0, 0)),      # logits (padded)
        ),
        scratch_shapes=[
            pltpu.VMEM((B, H), jnp.float32),                # h
            pltpu.VMEM((B, H), jnp.float32),                # c
            pltpu.VMEM((B, H), jnp.float32),                # feats
        ],
    )

    loss, logits_pad = pl.pallas_call(
        classifier_kernel,
        out_shape=(jax.ShapeDtypeStruct((1, 1), jnp.float32),
                   jax.ShapeDtypeStruct((B, CPAD), jnp.float32)),
        grid_spec=grid_spec,
        compiler_params=pltpu.CompilerParams(
            dimension_semantics=("arbitrary",),   # time carries the recurrence
            vmem_limit_bytes=32 * 1024 * 1024),
    )(x_tm, w_ih, w_hh, b_lstm, len2, w_out, b_out, tgt2)
    return loss[0, 0], logits_pad[:, :C]


def init_params(key, input_dim, hidden, num_classes):
    """Deterministic PyTorch-style init. Weights stored pre-transposed for x@W."""
    k = jax.random.split(key, 6)
    s_lstm = 1.0 / jnp.sqrt(hidden)
    s_lin = 1.0 / jnp.sqrt(hidden)
    w_ih = jax.random.uniform(k[0], (input_dim, 4 * hidden), jnp.float32, -s_lstm, s_lstm)
    w_hh = jax.random.uniform(k[1], (hidden, 4 * hidden), jnp.float32, -s_lstm, s_lstm)
    b_ih = jax.random.uniform(k[2], (1, 4 * hidden), jnp.float32, -s_lstm, s_lstm)
    b_hh = jax.random.uniform(k[3], (1, 4 * hidden), jnp.float32, -s_lstm, s_lstm)
    w_out = jax.random.uniform(k[4], (hidden, num_classes), jnp.float32, -s_lin, s_lin)
    b_out = jax.random.uniform(k[5], (1, num_classes), jnp.float32, -s_lin, s_lin)
    return {"w_ih": w_ih, "w_hh": w_hh, "b_lstm": b_ih + b_hh,
            "w_out": w_out, "b_out": b_out}


def reference_forward(x, targets, lengths, params):
    """Pure-JAX reference with the same mixed precision (bf16 matmuls, f32 math)."""
    B, T, D = x.shape
    H = params["w_hh"].shape[0]
    bf = jnp.bfloat16
    w_ih = params["w_ih"].astype(bf)
    w_hh = params["w_hh"].astype(bf)
    w_out = params["w_out"].astype(bf)
    h = jnp.zeros((B, H), jnp.float32)
    c = jnp.zeros((B, H), jnp.float32)
    feats = jnp.zeros((B, H), jnp.float32)
    for t in range(T):
        gates = (jnp.dot(x[:, t, :].astype(bf), w_ih, preferred_element_type=jnp.float32)
                 + jnp.dot(h.astype(bf), w_hh, preferred_element_type=jnp.float32)
                 + params["b_lstm"])
        i = jax.nn.sigmoid(gates[:, :H]); f = jax.nn.sigmoid(gates[:, H:2 * H])
        g = jnp.tanh(gates[:, 2 * H:3 * H]); o = jax.nn.sigmoid(gates[:, 3 * H:])
        c = f * c + i * g
        h = o * jnp.tanh(c)
        feats = jnp.where((lengths - 1)[:, None] == t, h, feats)
    logits = jnp.dot(feats.astype(bf), w_out,
                     preferred_element_type=jnp.float32) + params["b_out"]
    logp = jax.nn.log_softmax(logits, axis=-1)
    loss = -jnp.mean(logp[jnp.arange(B), targets])
    return loss, logits


if __name__ == "__main__":
    # batch, seq len, spectrogram feats, hidden size, classes
    B, T, D, H, C = 2, 16, 32, 32, 10

    key = jax.random.PRNGKey(0)
    kx, kt, kp = jax.random.split(key, 3)
    x = jax.random.normal(kx, (B, T, D), jnp.float32)
    targets = jax.random.randint(kt, (B,), 0, C, jnp.int32)
    lengths = jnp.array([T, 6], dtype=jnp.int32)   # last valid steps in different time blocks
    params = init_params(kp, D, H, C)

    loss, logits = classifier_forward(x, targets, lengths, params, time_block=8)
    jax.block_until_ready((loss, logits))

    loss_ref, logits_ref = reference_forward(x, targets, lengths, params)
    assert logits.shape == (B, C)
    assert jnp.allclose(logits, logits_ref, atol=5e-3, rtol=5e-3), "logits mismatch"
    assert jnp.allclose(loss, loss_ref, atol=5e-3, rtol=5e-3), "loss mismatch"

    print("KERNEL_OK")
</pallas_src>

<mosaic_0001>
module attributes {stable_mosaic.version = 11 : i64} {
  func.func @classifier_kernel(%arg0: i32, %arg1: memref<16x32xbf16, #tpu.memory_space<vmem>>, %arg2: memref<32x128xbf16, #tpu.memory_space<vmem>>, %arg3: memref<32x128xbf16, #tpu.memory_space<vmem>>, %arg4: memref<1x128xf32, #tpu.memory_space<vmem>>, %arg5: memref<2x1xi32, #tpu.memory_space<vmem>>, %arg6: memref<32x128xbf16, #tpu.memory_space<vmem>>, %arg7: memref<1x128xf32, #tpu.memory_space<vmem>>, %arg8: memref<2x1xi32, #tpu.memory_space<vmem>>, %arg9: memref<1x1xf32, #tpu.memory_space<vmem>>, %arg10: memref<2x128xf32, #tpu.memory_space<vmem>>, %arg11: memref<2x32xf32, #tpu.memory_space<vmem>>, %arg12: memref<2x32xf32, #tpu.memory_space<vmem>>, %arg13: memref<2x32xf32, #tpu.memory_space<vmem>>) attributes {dimension_semantics = [#tpu.dimension_semantics<arbitrary>], iteration_bounds = array<i64: 2>, scalar_prefetch = 0 : i64, scratch_operands = 3 : i64, tpu.core_type = #tpu.core_type<tc>, window_params = [{transform_indices = @transform_0, window_bounds = array<i64: 16, 32>}, {pipeline_mode = #tpu.pipeline_mode<synchronous>, transform_indices = @transform_1, window_bounds = array<i64: 32, 128>}, {pipeline_mode = #tpu.pipeline_mode<synchronous>, transform_indices = @transform_2, window_bounds = array<i64: 32, 128>}, {pipeline_mode = #tpu.pipeline_mode<synchronous>, transform_indices = @transform_3, window_bounds = array<i64: 1, 128>}, {pipeline_mode = #tpu.pipeline_mode<synchronous>, transform_indices = @transform_4, window_bounds = array<i64: 2, 1>}, {pipeline_mode = #tpu.pipeline_mode<synchronous>, transform_indices = @transform_5, window_bounds = array<i64: 32, 128>}, {pipeline_mode = #tpu.pipeline_mode<synchronous>, transform_indices = @transform_6, window_bounds = array<i64: 1, 128>}, {pipeline_mode = #tpu.pipeline_mode<synchronous>, transform_indices = @transform_7, window_bounds = array<i64: 2, 1>}, {pipeline_mode = #tpu.pipeline_mode<synchronous>, transform_indices = @transform_8, window_bounds = array<i64: 1, 1>}, {pipeline_mode = #tpu.pipeline_mode<synchronous>, transform_indices = @transform_9, window_bounds = array<i64: 2, 128>}]} {
    %c0_i32 = arith.constant 0 : i32
    %0 = arith.cmpi eq, %arg0, %c0_i32 : i32
    %1 = arith.extui %0 : i1 to i32
    %c0_i32_0 = arith.constant 0 : i32
    %2 = arith.cmpi ne, %1, %c0_i32_0 : i32
    scf.if %2 {
      %cst_58 = arith.constant 0.000000e+00 : f32
      %303 = vector.broadcast %cst_58 : f32 to vector<2x32xf32>
      %c0_59 = arith.constant 0 : index
      %c0_60 = arith.constant 0 : index
      %304 = vector.load %arg11[%c0_59, %c0_60] : memref<2x32xf32, #tpu.memory_space<vmem>>, vector<2x32xf32>
      tpu.vector_store %arg11[%c0_59, %c0_60], %303 {strides = array<i32>} : memref<2x32xf32, #tpu.memory_space<vmem>>, vector<2x32xf32>,
      %cst_61 = arith.constant 0.000000e+00 : f32
      %305 = vector.broadcast %cst_61 : f32 to vector<2x32xf32>
      %c0_62 = arith.constant 0 : index
      %c0_63 = arith.constant 0 : index
      %306 = vector.load %arg12[%c0_62, %c0_63] : memref<2x32xf32, #tpu.memory_space<vmem>>, vector<2x32xf32>
      tpu.vector_store %arg12[%c0_62, %c0_63], %305 {strides = array<i32>} : memref<2x32xf32, #tpu.memory_space<vmem>>, vector<2x32xf32>,
      %cst_64 = arith.constant 0.000000e+00 : f32
      %307 = vector.broadcast %cst_64 : f32 to vector<2x32xf32>
      %c0_65 = arith.constant 0 : index
      %c0_66 = arith.constant 0 : index
      %308 = vector.load %arg13[%c0_65, %c0_66] : memref<2x32xf32, #tpu.memory_space<vmem>>, vector<2x32xf32>
      tpu.vector_store %arg13[%c0_65, %c0_66], %307 {strides = array<i32>} : memref<2x32xf32, #tpu.memory_space<vmem>>, vector<2x32xf32>,
    } else {
    }
    %c0 = arith.constant 0 : index
    %c0_1 = arith.constant 0 : index
    %3 = vector.load %arg1[%c0, %c0_1] : memref<16x32xbf16, #tpu.memory_space<vmem>>, vector<16x32xbf16>
    %c0_2 = arith.constant 0 : index
    %c0_3 = arith.constant 0 : index
    %4 = vector.load %arg2[%c0_2, %c0_3] : memref<32x128xbf16, #tpu.memory_space<vmem>>, vector<32x128xbf16>
    %cst = arith.constant dense<0.000000e+00> : vector<16x128xf32>
    %5 = tpu.matmul %3, %4, %cst {dimension_numbers = #tpu.dot_dimension_numbers<[1], [0], [0], [1], [0, 0, 1, 1], [], []>} : vector<16x32xbf16>, vector<32x128xbf16>, vector<16x128xf32> -> vector<16x128xf32>
    %c0_4 = arith.constant 0 : index
    %c0_5 = arith.constant 0 : index
    %6 = vector.load %arg4[%c0_4, %c0_5] : memref<1x128xf32, #tpu.memory_space<vmem>>, vector<1x128xf32>
    %7 = vector.broadcast %6 : vector<1x128xf32> to vector<16x128xf32>
    %8 = arith.addf %5, %7 : vector<16x128xf32>
    %c0_6 = arith.constant 0 : index
    %c0_7 = arith.constant 0 : index
    %9 = vector.load %arg3[%c0_6, %c0_7] : memref<32x128xbf16, #tpu.memory_space<vmem>>, vector<32x128xbf16>
    %c0_8 = arith.constant 0 : index
    %c0_9 = arith.constant 0 : index
    %10 = vector.load %arg5[%c0_8, %c0_9] : memref<2x1xi32, #tpu.memory_space<vmem>>, vector<2x1xi32>
    %c1_i32 = arith.constant 1 : i32
    %11 = vector.broadcast %c1_i32 : i32 to vector<2x1xi32>
    %12 = arith.subi %10, %11 : vector<2x1xi32>
    %c8_i32 = arith.constant 8 : i32
    %13 = arith.muli %arg0, %c8_i32 : i32
    %c0_10 = arith.constant 0 : index
    %c0_11 = arith.constant 0 : index
    %14 = vector.load %arg11[%c0_10, %c0_11] : memref<2x32xf32, #tpu.memory_space<vmem>>, vector<2x32xf32>
    %c0_12 = arith.constant 0 : index
    %c0_13 = arith.constant 0 : index
    %15 = vector.load %arg12[%c0_12, %c0_13] : memref<2x32xf32, #tpu.memory_space<vmem>>, vector<2x32xf32>
    %c0_14 = arith.constant 0 : index
    %c0_15 = arith.constant 0 : index
    %16 = vector.load %arg13[%c0_14, %c0_15] : memref<2x32xf32, #tpu.memory_space<vmem>>, vector<2x32xf32>
    %17 = vector.extract_strided_slice %8 {offsets = [0, 0], sizes = [2, 128], strides = [1, 1]} : vector<16x128xf32> to vector<2x128xf32>
    %18 = arith.truncf %14 : vector<2x32xf32> to vector<2x32xbf16>
    %cst_16 = arith.constant dense<0.000000e+00> : vector<2x128xf32>
    %19 = tpu.matmul %18, %9, %cst_16 {dimension_numbers = #tpu.dot_dimension_numbers<[1], [0], [0], [1], [0, 0, 1, 1], [], []>} : vector<2x32xbf16>, vector<32x128xbf16>, vector<2x128xf32> -> vector<2x128xf32>
    %20 = arith.addf %17, %19 : vector<2x128xf32>
    %21 = vector.extract_strided_slice %20 {offsets = [0, 0], sizes = [2, 32], strides = [1, 1]} : vector<2x128xf32> to vector<2x32xf32>
    %22 = arith.negf %21 : vector<2x32xf32>
    %23 = math.exp %22 : vector<2x32xf32>
    %cst_17 = arith.constant 1.000000e+00 : f32
    %24 = vector.broadcast %cst_17 : f32 to vector<2x32xf32>
    %25 = arith.addf %24, %23 : vector<2x32xf32>
    %26 = arith.divf %24, %25 : vector<2x32xf32>
    %27 = vector.extract_strided_slice %20 {offsets = [0, 32], sizes = [2, 32], strides = [1, 1]} : vector<2x128xf32> to vector<2x32xf32>
    %28 = arith.negf %27 : vector<2x32xf32>
    %29 = math.exp %28 : vector<2x32xf32>
    %cst_18 = arith.constant 1.000000e+00 : f32
    %30 = vector.broadcast %cst_18 : f32 to vector<2x32xf32>
    %31 = arith.addf %30, %29 : vector<2x32xf32>
    %32 = arith.divf %30, %31 : vector<2x32xf32>
    %33 = vector.extract_strided_slice %20 {offsets = [0, 64], sizes = [2, 32], strides = [1, 1]} : vector<2x128xf32> to vector<2x32xf32>
    %34 = math.tanh %33 : vector<2x32xf32>
    %35 = vector.extract_strided_slice %20 {offsets = [0, 96], sizes = [2, 32], strides = [1, 1]} : vector<2x128xf32> to vector<2x32xf32>
    %36 = arith.negf %35 : vector<2x32xf32>
    %37 = math.exp %36 : vector<2x32xf32>
    %cst_19 = arith.constant 1.000000e+00 : f32
    %38 = vector.broadcast %cst_19 : f32 to vector<2x32xf32>
    %39 = arith.addf %38, %37 : vector<2x32xf32>
    %40 = arith.divf %38, %39 : vector<2x32xf32>
    %41 = arith.mulf %32, %15 : vector<2x32xf32>
    %42 = arith.mulf %26, %34 : vector<2x32xf32>
    %43 = arith.addf %41, %42 : vector<2x32xf32>
    %44 = math.tanh %43 : vector<2x32xf32>
    %45 = arith.mulf %40, %44 : vector<2x32xf32>
    %c0_i32_20 = arith.constant 0 : i32
    %46 = arith.addi %13, %c0_i32_20 : i32
    %47 = vector.broadcast %46 : i32 to vector<2x1xi32>
    %48 = arith.cmpi eq, %12, %47 : vector<2x1xi32>
    %49 = vector.shape_cast %48 : vector<2x1xi1> to vector<2x1xi1>
    %50 = vector.broadcast %49 : vector<2x1xi1> to vector<2x32xi1>
    %51 = arith.select %50, %45, %16 : vector<2x32xi1>, vector<2x32xf32>
    %52 = vector.extract_strided_slice %8 {offsets = [2, 0], sizes = [2, 128], strides = [1, 1]} : vector<16x128xf32> to vector<2x128xf32>
    %53 = arith.truncf %45 : vector<2x32xf32> to vector<2x32xbf16>
    %cst_21 = arith.constant dense<0.000000e+00> : vector<2x128xf32>
    %54 = tpu.matmul %53, %9, %cst_21 {dimension_numbers = #tpu.dot_dimension_numbers<[1], [0], [0], [1], [0, 0, 1, 1], [], []>} : vector<2x32xbf16>, vector<32x128xbf16>, vector<2x128xf32> -> vector<2x128xf32>
    %55 = arith.addf %52, %54 : vector<2x128xf32>
    %56 = vector.extract_strided_slice %55 {offsets = [0, 0], sizes = [2, 32], strides = [1, 1]} : vector<2x128xf32> to vector<2x32xf32>
    %57 = arith.negf %56 : vector<2x32xf32>
    %58 = math.exp %57 : vector<2x32xf32>
    %cst_22 = arith.constant 1.000000e+00 : f32
    %59 = vector.broadcast %cst_22 : f32 to vector<2x32xf32>
    %60 = arith.addf %59, %58 : vector<2x32xf32>
    %61 = arith.divf %59, %60 : vector<2x32xf32>
    %62 = vector.extract_strided_slice %55 {offsets = [0, 32], sizes = [2, 32], strides = [1, 1]} : vector<2x128xf32> to vector<2x32xf32>
    %63 = arith.negf %62 : vector<2x32xf32>
    %64 = math.exp %63 : vector<2x32xf32>
    %cst_23 = arith.constant 1.000000e+00 : f32
    %65 = vector.broadcast %cst_23 : f32 to vector<2x32xf32>
    %66 = arith.addf %65, %64 : vector<2x32xf32>
    %67 = arith.divf %65, %66 : vector<2x32xf32>
    %68 = vector.extract_strided_slice %55 {offsets = [0, 64], sizes = [2, 32], strides = [1, 1]} : vector<2x128xf32> to vector<2x32xf32>
    %69 = math.tanh %68 : vector<2x32xf32>
    %70 = vector.extract_strided_slice %55 {offsets = [0, 96], sizes = [2, 32], strides = [1, 1]} : vector<2x128xf32> to vector<2x32xf32>
    %71 = arith.negf %70 : vector<2x32xf32>
    %72 = math.exp %71 : vector<2x32xf32>
    %cst_24 = arith.constant 1.000000e+00 : f32
    %73 = vector.broadcast %cst_24 : f32 to vector<2x32xf32>
    %74 = arith.addf %73, %72 : vector<2x32xf32>
    %75 = arith.divf %73, %74 : vector<2x32xf32>
    %76 = arith.mulf %67, %43 : vector<2x32xf32>
    %77 = arith.mulf %61, %69 : vector<2x32xf32>
    %78 = arith.addf %76, %77 : vector<2x32xf32>
    %79 = math.tanh %78 : vector<2x32xf32>
    %80 = arith.mulf %75, %79 : vector<2x32xf32>
    %c1_i32_25 = arith.constant 1 : i32
    %81 = arith.addi %13, %c1_i32_25 : i32
    %82 = vector.broadcast %81 : i32 to vector<2x1xi32>
    %83 = arith.cmpi eq, %12, %82 : vector<2x1xi32>
    %84 = vector.shape_cast %83 : vector<2x1xi1> to vector<2x1xi1>
    %85 = vector.broadcast %84 : vector<2x1xi1> to vector<2x32xi1>
    %86 = arith.select %85, %80, %51 : vector<2x32xi1>, vector<2x32xf32>
    %87 = vector.extract_strided_slice %8 {offsets = [4, 0], sizes = [2, 128], strides = [1, 1]} : vector<16x128xf32> to vector<2x128xf32>
    %88 = arith.truncf %80 : vector<2x32xf32> to vector<2x32xbf16>
    %cst_26 = arith.constant dense<0.000000e+00> : vector<2x128xf32>
    %89 = tpu.matmul %88, %9, %cst_26 {dimension_numbers = #tpu.dot_dimension_numbers<[1], [0], [0], [1], [0, 0, 1, 1], [], []>} : vector<2x32xbf16>, vector<32x128xbf16>, vector<2x128xf32> -> vector<2x128xf32>
    %90 = arith.addf %87, %89 : vector<2x128xf32>
    %91 = vector.extract_strided_slice %90 {offsets = [0, 0], sizes = [2, 32], strides = [1, 1]} : vector<2x128xf32> to vector<2x32xf32>
    %92 = arith.negf %91 : vector<2x32xf32>
    %93 = math.exp %92 : vector<2x32xf32>
    %cst_27 = arith.constant 1.000000e+00 : f32
    %94 = vector.broadcast %cst_27 : f32 to vector<2x32xf32>
    %95 = arith.addf %94, %93 : vector<2x32xf32>
    %96 = arith.divf %94, %95 : vector<2x32xf32>
    %97 = vector.extract_strided_slice %90 {offsets = [0, 32], sizes = [2, 32], strides = [1, 1]} : vector<2x128xf32> to vector<2x32xf32>
    %98 = arith.negf %97 : vector<2x32xf32>
    %99 = math.exp %98 : vector<2x32xf32>
    %cst_28 = arith.constant 1.000000e+00 : f32
    %100 = vector.broadcast %cst_28 : f32 to vector<2x32xf32>
    %101 = arith.addf %100, %99 : vector<2x32xf32>
    %102 = arith.divf %100, %101 : vector<2x32xf32>
    %103 = vector.extract_strided_slice %90 {offsets = [0, 64], sizes = [2, 32], strides = [1, 1]} : vector<2x128xf32> to vector<2x32xf32>
    %104 = math.tanh %103 : vector<2x32xf32>
    %105 = vector.extract_strided_slice %90 {offsets = [0, 96], sizes = [2, 32], strides = [1, 1]} : vector<2x128xf32> to vector<2x32xf32>
    %106 = arith.negf %105 : vector<2x32xf32>
    %107 = math.exp %106 : vector<2x32xf32>
    %cst_29 = arith.constant 1.000000e+00 : f32
    %108 = vector.broadcast %cst_29 : f32 to vector<2x32xf32>
    %109 = arith.addf %108, %107 : vector<2x32xf32>
    %110 = arith.divf %108, %109 : vector<2x32xf32>
    %111 = arith.mulf %102, %78 : vector<2x32xf32>
    %112 = arith.mulf %96, %104 : vector<2x32xf32>
    %113 = arith.addf %111, %112 : vector<2x32xf32>
    %114 = math.tanh %113 : vector<2x32xf32>
    %115 = arith.mulf %110, %114 : vector<2x32xf32>
    %c2_i32 = arith.constant 2 : i32
    %116 = arith.addi %13, %c2_i32 : i32
    %117 = vector.broadcast %116 : i32 to vector<2x1xi32>
    %118 = arith.cmpi eq, %12, %117 : vector<2x1xi32>
    %119 = vector.shape_cast %118 : vector<2x1xi1> to vector<2x1xi1>
    %120 = vector.broadcast %119 : vector<2x1xi1> to vector<2x32xi1>
    %121 = arith.select %120, %115, %86 : vector<2x32xi1>, vector<2x32xf32>
    %122 = vector.extract_strided_slice %8 {offsets = [6, 0], sizes = [2, 128], strides = [1, 1]} : vector<16x128xf32> to vector<2x128xf32>
    %123 = arith.truncf %115 : vector<2x32xf32> to vector<2x32xbf16>
    %cst_30 = arith.constant dense<0.000000e+00> : vector<2x128xf32>
    %124 = tpu.matmul %123, %9, %cst_30 {dimension_numbers = #tpu.dot_dimension_numbers<[1], [0], [0], [1], [0, 0, 1, 1], [], []>} : vector<2x32xbf16>, vector<32x128xbf16>, vector<2x128xf32> -> vector<2x128xf32>
    %125 = arith.addf %122, %124 : vector<2x128xf32>
    %126 = vector.extract_strided_slice %125 {offsets = [0, 0], sizes = [2, 32], strides = [1, 1]} : vector<2x128xf32> to vector<2x32xf32>
    %127 = arith.negf %126 : vector<2x32xf32>
    %128 = math.exp %127 : vector<2x32xf32>
    %cst_31 = arith.constant 1.000000e+00 : f32
    %129 = vector.broadcast %cst_31 : f32 to vector<2x32xf32>
    %130 = arith.addf %129, %128 : vector<2x32xf32>
    %131 = arith.divf %129, %130 : vector<2x32xf32>
    %132 = vector.extract_strided_slice %125 {offsets = [0, 32], sizes = [2, 32], strides = [1, 1]} : vector<2x128xf32> to vector<2x32xf32>
    %133 = arith.negf %132 : vector<2x32xf32>
    %134 = math.exp %133 : vector<2x32xf32>
    %cst_32 = arith.constant 1.000000e+00 : f32
    %135 = vector.broadcast %cst_32 : f32 to vector<2x32xf32>
    %136 = arith.addf %135, %134 : vector<2x32xf32>
    %137 = arith.divf %135, %136 : vector<2x32xf32>
    %138 = vector.extract_strided_slice %125 {offsets = [0, 64], sizes = [2, 32], strides = [1, 1]} : vector<2x128xf32> to vector<2x32xf32>
    %139 = math.tanh %138 : vector<2x32xf32>
    %140 = vector.extract_strided_slice %125 {offsets = [0, 96], sizes = [2, 32], strides = [1, 1]} : vector<2x128xf32> to vector<2x32xf32>
    %141 = arith.negf %140 : vector<2x32xf32>
    %142 = math.exp %141 : vector<2x32xf32>
    %cst_33 = arith.constant 1.000000e+00 : f32
    %143 = vector.broadcast %cst_33 : f32 to vector<2x32xf32>
    %144 = arith.addf %143, %142 : vector<2x32xf32>
    %145 = arith.divf %143, %144 : vector<2x32xf32>
    %146 = arith.mulf %137, %113 : vector<2x32xf32>
    %147 = arith.mulf %131, %139 : vector<2x32xf32>
    %148 = arith.addf %146, %147 : vector<2x32xf32>
    %149 = math.tanh %148 : vector<2x32xf32>
    %150 = arith.mulf %145, %149 : vector<2x32xf32>
    %c3_i32 = arith.constant 3 : i32
    %151 = arith.addi %13, %c3_i32 : i32
    %152 = vector.broadcast %151 : i32 to vector<2x1xi32>
    %153 = arith.cmpi eq, %12, %152 : vector<2x1xi32>
    %154 = vector.shape_cast %153 : vector<2x1xi1> to vector<2x1xi1>
    %155 = vector.broadcast %154 : vector<2x1xi1> to vector<2x32xi1>
    %156 = arith.select %155, %150, %121 : vector<2x32xi1>, vector<2x32xf32>
    %157 = vector.extract_strided_slice %8 {offsets = [8, 0], sizes = [2, 128], strides = [1, 1]} : vector<16x128xf32> to vector<2x128xf32>
    %158 = arith.truncf %150 : vector<2x32xf32> to vector<2x32xbf16>
    %cst_34 = arith.constant dense<0.000000e+00> : vector<2x128xf32>
    %159 = tpu.matmul %158, %9, %cst_34 {dimension_numbers = #tpu.dot_dimension_numbers<[1], [0], [0], [1], [0, 0, 1, 1], [], []>} : vector<2x32xbf16>, vector<32x128xbf16>, vector<2x128xf32> -> vector<2x128xf32>
    %160 = arith.addf %157, %159 : vector<2x128xf32>
    %161 = vector.extract_strided_slice %160 {offsets = [0, 0], sizes = [2, 32], strides = [1, 1]} : vector<2x128xf32> to vector<2x32xf32>
    %162 = arith.negf %161 : vector<2x32xf32>
    %163 = math.exp %162 : vector<2x32xf32>
    %cst_35 = arith.constant 1.000000e+00 : f32
    %164 = vector.broadcast %cst_35 : f32 to vector<2x32xf32>
    %165 = arith.addf %164, %163 : vector<2x32xf32>
    %166 = arith.divf %164, %165 : vector<2x32xf32>
    %167 = vector.extract_strided_slice %160 {offsets = [0, 32], sizes = [2, 32], strides = [1, 1]} : vector<2x128xf32> to vector<2x32xf32>
    %168 = arith.negf %167 : vector<2x32xf32>
    %169 = math.exp %168 : vector<2x32xf32>
    %cst_36 = arith.constant 1.000000e+00 : f32
    %170 = vector.broadcast %cst_36 : f32 to vector<2x32xf32>
    %171 = arith.addf %170, %169 : vector<2x32xf32>
    %172 = arith.divf %170, %171 : vector<2x32xf32>
    %173 = vector.extract_strided_slice %160 {offsets = [0, 64], sizes = [2, 32], strides = [1, 1]} : vector<2x128xf32> to vector<2x32xf32>
    %174 = math.tanh %173 : vector<2x32xf32>
    %175 = vector.extract_strided_slice %160 {offsets = [0, 96], sizes = [2, 32], strides = [1, 1]} : vector<2x128xf32> to vector<2x32xf32>
    %176 = arith.negf %175 : vector<2x32xf32>
    %177 = math.exp %176 : vector<2x32xf32>
    %cst_37 = arith.constant 1.000000e+00 : f32
    %178 = vector.broadcast %cst_37 : f32 to vector<2x32xf32>
    %179 = arith.addf %178, %177 : vector<2x32xf32>
    %180 = arith.divf %178, %179 : vector<2x32xf32>
    %181 = arith.mulf %172, %148 : vector<2x32xf32>
    %182 = arith.mulf %166, %174 : vector<2x32xf32>
    %183 = arith.addf %181, %182 : vector<2x32xf32>
    %184 = math.tanh %183 : vector<2x32xf32>
    %185 = arith.mulf %180, %184 : vector<2x32xf32>
    %c4_i32 = arith.constant 4 : i32
    %186 = arith.addi %13, %c4_i32 : i32
    %187 = vector.broadcast %186 : i32 to vector<2x1xi32>
    %188 = arith.cmpi eq, %12, %187 : vector<2x1xi32>
    %189 = vector.shape_cast %188 : vector<2x1xi1> to vector<2x1xi1>
    %190 = vector.broadcast %189 : vector<2x1xi1> to vector<2x32xi1>
    %191 = arith.select %190, %185, %156 : vector<2x32xi1>, vector<2x32xf32>
    %192 = vector.extract_strided_slice %8 {offsets = [10, 0], sizes = [2, 128], strides = [1, 1]} : vector<16x128xf32> to vector<2x128xf32>
    %193 = arith.truncf %185 : vector<2x32xf32> to vector<2x32xbf16>
    %cst_38 = arith.constant dense<0.000000e+00> : vector<2x128xf32>
    %194 = tpu.matmul %193, %9, %cst_38 {dimension_numbers = #tpu.dot_dimension_numbers<[1], [0], [0], [1], [0, 0, 1, 1], [], []>} : vector<2x32xbf16>, vector<32x128xbf16>, vector<2x128xf32> -> vector<2x128xf32>
    %195 = arith.addf %192, %194 : vector<2x128xf32>
    %196 = vector.extract_strided_slice %195 {offsets = [0, 0], sizes = [2, 32], strides = [1, 1]} : vector<2x128xf32> to vector<2x32xf32>
    %197 = arith.negf %196 : vector<2x32xf32>
    %198 = math.exp %197 : vector<2x32xf32>
    %cst_39 = arith.constant 1.000000e+00 : f32
    %199 = vector.broadcast %cst_39 : f32 to vector<2x32xf32>
    %200 = arith.addf %199, %198 : vector<2x32xf32>
    %201 = arith.divf %199, %200 : vector<2x32xf32>
    %202 = vector.extract_strided_slice %195 {offsets = [0, 32], sizes = [2, 32], strides = [1, 1]} : vector<2x128xf32> to vector<2x32xf32>
    %203 = arith.negf %202 : vector<2x32xf32>
    %204 = math.exp %203 : vector<2x32xf32>
    %cst_40 = arith.constant 1.000000e+00 : f32
    %205 = vector.broadcast %cst_40 : f32 to vector<2x32xf32>
    %206 = arith.addf %205, %204 : vector<2x32xf32>
    %207 = arith.divf %205, %206 : vector<2x32xf32>
    %208 = vector.extract_strided_slice %195 {offsets = [0, 64], sizes = [2, 32], strides = [1, 1]} : vector<2x128xf32> to vector<2x32xf32>
    %209 = math.tanh %208 : vector<2x32xf32>
    %210 = vector.extract_strided_slice %195 {offsets = [0, 96], sizes = [2, 32], strides = [1, 1]} : vector<2x128xf32> to vector<2x32xf32>
    %211 = arith.negf %210 : vector<2x32xf32>
    %212 = math.exp %211 : vector<2x32xf32>
    %cst_41 = arith.constant 1.000000e+00 : f32
    %213 = vector.broadcast %cst_41 : f32 to vector<2x32xf32>
    %214 = arith.addf %213, %212 : vector<2x32xf32>
    %215 = arith.divf %213, %214 : vector<2x32xf32>
    %216 = arith.mulf %207, %183 : vector<2x32xf32>
    %217 = arith.mulf %201, %209 : vector<2x32xf32>
    %218 = arith.addf %216, %217 : vector<2x32xf32>
    %219 = math.tanh %218 : vector<2x32xf32>
    %220 = arith.mulf %215, %219 : vector<2x32xf32>
    %c5_i32 = arith.constant 5 : i32
    %221 = arith.addi %13, %c5_i32 : i32
    %222 = vector.broadcast %221 : i32 to vector<2x1xi32>
    %223 = arith.cmpi eq, %12, %222 : vector<2x1xi32>
    %224 = vector.shape_cast %223 : vector<2x1xi1> to vector<2x1xi1>
    %225 = vector.broadcast %224 : vector<2x1xi1> to vector<2x32xi1>
    %226 = arith.select %225, %220, %191 : vector<2x32xi1>, vector<2x32xf32>
    %227 = vector.extract_strided_slice %8 {offsets = [12, 0], sizes = [2, 128], strides = [1, 1]} : vector<16x128xf32> to vector<2x128xf32>
    %228 = arith.truncf %220 : vector<2x32xf32> to vector<2x32xbf16>
    %cst_42 = arith.constant dense<0.000000e+00> : vector<2x128xf32>
    %229 = tpu.matmul %228, %9, %cst_42 {dimension_numbers = #tpu.dot_dimension_numbers<[1], [0], [0], [1], [0, 0, 1, 1], [], []>} : vector<2x32xbf16>, vector<32x128xbf16>, vector<2x128xf32> -> vector<2x128xf32>
    %230 = arith.addf %227, %229 : vector<2x128xf32>
    %231 = vector.extract_strided_slice %230 {offsets = [0, 0], sizes = [2, 32], strides = [1, 1]} : vector<2x128xf32> to vector<2x32xf32>
    %232 = arith.negf %231 : vector<2x32xf32>
    %233 = math.exp %232 : vector<2x32xf32>
    %cst_43 = arith.constant 1.000000e+00 : f32
    %234 = vector.broadcast %cst_43 : f32 to vector<2x32xf32>
    %235 = arith.addf %234, %233 : vector<2x32xf32>
    %236 = arith.divf %234, %235 : vector<2x32xf32>
    %237 = vector.extract_strided_slice %230 {offsets = [0, 32], sizes = [2, 32], strides = [1, 1]} : vector<2x128xf32> to vector<2x32xf32>
    %238 = arith.negf %237 : vector<2x32xf32>
    %239 = math.exp %238 : vector<2x32xf32>
    %cst_44 = arith.constant 1.000000e+00 : f32
    %240 = vector.broadcast %cst_44 : f32 to vector<2x32xf32>
    %241 = arith.addf %240, %239 : vector<2x32xf32>
    %242 = arith.divf %240, %241 : vector<2x32xf32>
    %243 = vector.extract_strided_slice %230 {offsets = [0, 64], sizes = [2, 32], strides = [1, 1]} : vector<2x128xf32> to vector<2x32xf32>
    %244 = math.tanh %243 : vector<2x32xf32>
    %245 = vector.extract_strided_slice %230 {offsets = [0, 96], sizes = [2, 32], strides = [1, 1]} : vector<2x128xf32> to vector<2x32xf32>
    %246 = arith.negf %245 : vector<2x32xf32>
    %247 = math.exp %246 : vector<2x32xf32>
    %cst_45 = arith.constant 1.000000e+00 : f32
    %248 = vector.broadcast %cst_45 : f32 to vector<2x32xf32>
    %249 = arith.addf %248, %247 : vector<2x32xf32>
    %250 = arith.divf %248, %249 : vector<2x32xf32>
    %251 = arith.mulf %242, %218 : vector<2x32xf32>
    %252 = arith.mulf %236, %244 : vector<2x32xf32>
    %253 = arith.addf %251, %252 : vector<2x32xf32>
    %254 = math.tanh %253 : vector<2x32xf32>
    %255 = arith.mulf %250, %254 : vector<2x32xf32>
    %c6_i32 = arith.constant 6 : i32
    %256 = arith.addi %13, %c6_i32 : i32
    %257 = vector.broadcast %256 : i32 to vector<2x1xi32>
    %258 = arith.cmpi eq, %12, %257 : vector<2x1xi32>
    %259 = vector.shape_cast %258 : vector<2x1xi1> to vector<2x1xi1>
    %260 = vector.broadcast %259 : vector<2x1xi1> to vector<2x32xi1>
    %261 = arith.select %260, %255, %226 : vector<2x32xi1>, vector<2x32xf32>
    %262 = vector.extract_strided_slice %8 {offsets = [14, 0], sizes = [2, 128], strides = [1, 1]} : vector<16x128xf32> to vector<2x128xf32>
    %263 = arith.truncf %255 : vector<2x32xf32> to vector<2x32xbf16>
    %cst_46 = arith.constant dense<0.000000e+00> : vector<2x128xf32>
    %264 = tpu.matmul %263, %9, %cst_46 {dimension_numbers = #tpu.dot_dimension_numbers<[1], [0], [0], [1], [0, 0, 1, 1], [], []>} : vector<2x32xbf16>, vector<32x128xbf16>, vector<2x128xf32> -> vector<2x128xf32>
    %265 = arith.addf %262, %264 : vector<2x128xf32>
    %266 = vector.extract_strided_slice %265 {offsets = [0, 0], sizes = [2, 32], strides = [1, 1]} : vector<2x128xf32> to vector<2x32xf32>
    %267 = arith.negf %266 : vector<2x32xf32>
    %268 = math.exp %267 : vector<2x32xf32>
    %cst_47 = arith.constant 1.000000e+00 : f32
    %269 = vector.broadcast %cst_47 : f32 to vector<2x32xf32>
    %270 = arith.addf %269, %268 : vector<2x32xf32>
    %271 = arith.divf %269, %270 : vector<2x32xf32>
    %272 = vector.extract_strided_slice %265 {offsets = [0, 32], sizes = [2, 32], strides = [1, 1]} : vector<2x128xf32> to vector<2x32xf32>
    %273 = arith.negf %272 : vector<2x32xf32>
    %274 = math.exp %273 : vector<2x32xf32>
    %cst_48 = arith.constant 1.000000e+00 : f32
    %275 = vector.broadcast %cst_48 : f32 to vector<2x32xf32>
    %276 = arith.addf %275, %274 : vector<2x32xf32>
    %277 = arith.divf %275, %276 : vector<2x32xf32>
    %278 = vector.extract_strided_slice %265 {offsets = [0, 64], sizes = [2, 32], strides = [1, 1]} : vector<2x128xf32> to vector<2x32xf32>
    %279 = math.tanh %278 : vector<2x32xf32>
    %280 = vector.extract_strided_slice %265 {offsets = [0, 96], sizes = [2, 32], strides = [1, 1]} : vector<2x128xf32> to vector<2x32xf32>
    %281 = arith.negf %280 : vector<2x32xf32>
    %282 = math.exp %281 : vector<2x32xf32>
    %cst_49 = arith.constant 1.000000e+00 : f32
    %283 = vector.broadcast %cst_49 : f32 to vector<2x32xf32>
    %284 = arith.addf %283, %282 : vector<2x32xf32>
    %285 = arith.divf %283, %284 : vector<2x32xf32>
    %286 = arith.mulf %277, %253 : vector<2x32xf32>
    %287 = arith.mulf %271, %279 : vector<2x32xf32>
    %288 = arith.addf %286, %287 : vector<2x32xf32>
    %289 = math.tanh %288 : vector<2x32xf32>
    %290 = arith.mulf %285, %289 : vector<2x32xf32>
    %c7_i32 = arith.constant 7 : i32
    %291 = arith.addi %13, %c7_i32 : i32
    %292 = vector.broadcast %291 : i32 to vector<2x1xi32>
    %293 = arith.cmpi eq, %12, %292 : vector<2x1xi32>
    %294 = vector.shape_cast %293 : vector<2x1xi1> to vector<2x1xi1>
    %295 = vector.broadcast %294 : vector<2x1xi1> to vector<2x32xi1>
    %296 = arith.select %295, %290, %261 : vector<2x32xi1>, vector<2x32xf32>
    %c0_50 = arith.constant 0 : index
    %c0_51 = arith.constant 0 : index
    %297 = vector.load %arg11[%c0_50, %c0_51] : memref<2x32xf32, #tpu.memory_space<vmem>>, vector<2x32xf32>
    tpu.vector_store %arg11[%c0_50, %c0_51], %290 {strides = array<i32>} : memref<2x32xf32, #tpu.memory_space<vmem>>, vector<2x32xf32>,
    %c0_52 = arith.constant 0 : index
    %c0_53 = arith.constant 0 : index
    %298 = vector.load %arg12[%c0_52, %c0_53] : memref<2x32xf32, #tpu.memory_space<vmem>>, vector<2x32xf32>
    tpu.vector_store %arg12[%c0_52, %c0_53], %288 {strides = array<i32>} : memref<2x32xf32, #tpu.memory_space<vmem>>, vector<2x32xf32>,
    %c0_54 = arith.constant 0 : index
    %c0_55 = arith.constant 0 : index
    %299 = vector.load %arg13[%c0_54, %c0_55] : memref<2x32xf32, #tpu.memory_space<vmem>>, vector<2x32xf32>
    tpu.vector_store %arg13[%c0_54, %c0_55], %296 {strides = array<i32>} : memref<2x32xf32, #tpu.memory_space<vmem>>, vector<2x32xf32>,
    %c1_i32_56 = arith.constant 1 : i32
    %300 = arith.cmpi eq, %arg0, %c1_i32_56 : i32
    %301 = arith.extui %300 : i1 to i32
    %c0_i32_57 = arith.constant 0 : i32
    %302 = arith.cmpi ne, %301, %c0_i32_57 : i32
    scf.if %302 {
      %303 = arith.truncf %296 : vector<2x32xf32> to vector<2x32xbf16>
      %c0_58 = arith.constant 0 : index
      %c0_59 = arith.constant 0 : index
      %304 = vector.load %arg6[%c0_58, %c0_59] : memref<32x128xbf16, #tpu.memory_space<vmem>>, vector<32x128xbf16>
      %cst_60 = arith.constant dense<0.000000e+00> : vector<2x128xf32>
      %305 = tpu.matmul %303, %304, %cst_60 {dimension_numbers = #tpu.dot_dimension_numbers<[1], [0], [0], [1], [0, 0, 1, 1], [], []>} : vector<2x32xbf16>, vector<32x128xbf16>, vector<2x128xf32> -> vector<2x128xf32>
      %c0_61 = arith.constant 0 : index
      %c0_62 = arith.constant 0 : index
      %306 = vector.load %arg7[%c0_61, %c0_62] : memref<1x128xf32, #tpu.memory_space<vmem>>, vector<1x128xf32>
      %307 = vector.broadcast %306 : vector<1x128xf32> to vector<2x128xf32>
      %308 = arith.addf %305, %307 : vector<2x128xf32>
      %c0_63 = arith.constant 0 : index
      %c0_64 = arith.constant 0 : index
      %309 = vector.load %arg10[%c0_63, %c0_64] : memref<2x128xf32, #tpu.memory_space<vmem>>, vector<2x128xf32>
      tpu.vector_store %arg10[%c0_63, %c0_64], %308 {strides = array<i32>} : memref<2x128xf32, #tpu.memory_space<vmem>>, vector<2x128xf32>,
      %cst_65 = arith.constant dense<0xFF800000> : vector<2xf32>
      %310 = vector.multi_reduction <maximumf>, %308, %cst_65 [1] : vector<2x128xf32> to vector<2xf32>
      %311 = vector.shape_cast %310 : vector<2xf32> to vector<2x1xf32>
      %312 = vector.broadcast %311 : vector<2x1xf32> to vector<2x128xf32>
      %313 = arith.subf %308, %312 : vector<2x128xf32>
      %314 = math.exp %313 : vector<2x128xf32>
      %cst_66 = arith.constant dense<0.000000e+00> : vector<2xf32>
      %315 = vector.multi_reduction <add>, %314, %cst_66 [1] : vector<2x128xf32> to vector<2xf32>
      %316 = vector.shape_cast %315 : vector<2xf32> to vector<2x1xf32>
      %317 = math.log %316 : vector<2x1xf32>
      %318 = arith.addf %317, %311 : vector<2x1xf32>
      %319 = tpu.iota {dimensions = array<i32: 1>} : vector<2x128xi32>
      %c0_67 = arith.constant 0 : index
      %c0_68 = arith.constant 0 : index
      %320 = vector.load %arg8[%c0_67, %c0_68] : memref<2x1xi32, #tpu.memory_space<vmem>>, vector<2x1xi32>
      %321 = vector.broadcast %320 : vector<2x1xi32> to vector<2x128xi32>
      %322 = arith.cmpi eq, %319, %321 : vector<2x128xi32>
      %cst_69 = arith.constant 0.000000e+00 : f32
      %323 = vector.broadcast %cst_69 : f32 to vector<2x128xf32>
      %324 = arith.select %322, %308, %323 : vector<2x128xi1>, vector<2x128xf32>
      %cst_70 = arith.constant dense<0.000000e+00> : vector<2xf32>
      %325 = vector.multi_reduction <add>, %324, %cst_70 [1] : vector<2x128xf32> to vector<2xf32>
      %326 = vector.shape_cast %325 : vector<2xf32> to vector<2x1xf32>
      %327 = arith.subf %318, %326 : vector<2x1xf32>
      %cst_71 = arith.constant dense<0.000000e+00> : vector<1xf32>
      %328 = vector.multi_reduction <add>, %327, %cst_71 [0] : vector<2x1xf32> to vector<1xf32>
      %329 = vector.shape_cast %328 : vector<1xf32> to vector<1x1xf32>
      %cst_72 = arith.constant 5.000000e-01 : f32
      %330 = vector.broadcast %cst_72 : f32 to vector<1x1xf32>
      %331 = arith.mulf %329, %330 : vector<1x1xf32>
      %c0_73 = arith.constant 0 : index
      %c0_74 = arith.constant 0 : index
      %332 = vector.load %arg9[%c0_73, %c0_74] : memref<1x1xf32, #tpu.memory_space<vmem>>, vector<1x1xf32>
      tpu.vector_store %arg9[%c0_73, %c0_74], %331 {strides = array<i32>} : memref<1x1xf32, #tpu.memory_space<vmem>>, vector<1x1xf32>,
    } else {
    }
    return
  }
  func.func @transform_0(%arg0: i32) -> (i32, i32) {
    %c0_i32 = arith.constant 0 : i32
    %c0_i32_0 = arith.constant 0 : i32
    return %arg0, %c0_i32 : i32, i32
  }
  func.func @transform_1(%arg0: i32) -> (i32, i32) {
    %c0_i32 = arith.constant 0 : i32
    %c0_i32_0 = arith.constant 0 : i32
    %c0_i32_1 = arith.constant 0 : i32
    return %c0_i32, %c0_i32_0 : i32, i32
  }
  func.func @transform_2(%arg0: i32) -> (i32, i32) {
    %c0_i32 = arith.constant 0 : i32
    %c0_i32_0 = arith.constant 0 : i32
    %c0_i32_1 = arith.constant 0 : i32
    return %c0_i32, %c0_i32_0 : i32, i32
  }
  func.func @transform_3(%arg0: i32) -> (i32, i32) {
    %c0_i32 = arith.constant 0 : i32
    %c0_i32_0 = arith.constant 0 : i32
    %c0_i32_1 = arith.constant 0 : i32
    return %c0_i32, %c0_i32_0 : i32, i32
  }
  func.func @transform_4(%arg0: i32) -> (i32, i32) {
    %c0_i32 = arith.constant 0 : i32
    %c0_i32_0 = arith.constant 0 : i32
    %c0_i32_1 = arith.constant 0 : i32
    return %c0_i32, %c0_i32_0 : i32, i32
  }
  func.func @transform_5(%arg0: i32) -> (i32, i32) {
    %c0_i32 = arith.constant 0 : i32
    %c0_i32_0 = arith.constant 0 : i32
    %c0_i32_1 = arith.constant 0 : i32
    return %c0_i32, %c0_i32_0 : i32, i32
  }
  func.func @transform_6(%arg0: i32) -> (i32, i32) {
    %c0_i32 = arith.constant 0 : i32
    %c0_i32_0 = arith.constant 0 : i32
    %c0_i32_1 = arith.constant 0 : i32
    return %c0_i32, %c0_i32_0 : i32, i32
  }
  func.func @transform_7(%arg0: i32) -> (i32, i32) {
    %c0_i32 = arith.constant 0 : i32
    %c0_i32_0 = arith.constant 0 : i32
    %c0_i32_1 = arith.constant 0 : i32
    return %c0_i32, %c0_i32_0 : i32, i32
  }
  func.func @transform_8(%arg0: i32) -> (i32, i32) {
    %c0_i32 = arith.constant 0 : i32
    %c0_i32_0 = arith.constant 0 : i32
    %c0_i32_1 = arith.constant 0 : i32
    return %c0_i32, %c0_i32_0 : i32, i32
  }
  func.func @transform_9(%arg0: i32) -> (i32, i32) {
    %c0_i32 = arith.constant 0 : i32
    %c0_i32_0 = arith.constant 0 : i32
    %c0_i32_1 = arith.constant 0 : i32
    return %c0_i32, %c0_i32_0 : i32, i32
  }
}

</mosaic_0001>

<bundles_post_ra>
// kernel: tpu_custom_call.1
= control target key start
LH: loop header
LB: loop body
LE: loop exit
PB: predicated region body
PF: predicated region fallthrough
CT: control target
= control target key end

     0   :  { %s2141_s0 = inlined_call_operand.hbm [shape: bf16[32,32], index: 0, kind: input, shape index: {}]   ;;  %s2142_s1 = inlined_call_operand.hbm [shape: bf16[32,128], index: 1, kind: input, shape index: {}]   ;;  %s2143_s2 = inlined_call_operand.hbm [shape: bf16[32,128], index: 2, kind: input, shape index: {}]   ;;  %s2144_s3 = inlined_call_operand.vmem [shape: f32[1,128], index: 3, kind: input, shape index: {}]   ;;  %s2145_s4 = inlined_call_operand.vmem [shape: s32[2,1], index: 4, kind: input, shape index: {}]   ;;  %s2146_s5 = inlined_call_operand.hbm [shape: bf16[32,128], index: 5, kind: input, shape index: {}]   ;;  %s2147_s6 = inlined_call_operand.vmem [shape: f32[1,128], index: 6, kind: input, shape index: {}]   ;;  %s2148_s7 = inlined_call_operand.vmem [shape: s32[2,1], index: 7, kind: input, shape index: {}]   ;;  %s2149_s8 = inlined_call_operand.hbm [shape: f32[1,1], index: 8, kind: output, shape index: {0}]   ;;  %s2150_s9 = inlined_call_operand.hbm [shape: f32[2,128], index: 9, kind: output, shape index: {1}]  }
   0x1   :  { %2151 = sst [smem:[#allocation21_spill]] %s2142_s1 }
   0x2   :  { %2152 = sst [smem:[#allocation22_spill]] %s2143_s2 }
   0x3   :  { %15 = vsyncpa [#allocation6], 0 }
   0x4   :  { %17 = vsyncpa [#allocation6 + $0x1], 0 }
   0x5   :  { %18 = vsyncpa [#allocation9], 0 }
   0x6   :  { %19 = vsyncpa [#allocation12], 0 }
   0x7   :  { %20 = vsyncpa [#allocation7], 0 }
   0x8   :  { %21 = vsyncpa [#allocation15], 0  ;;  %s1829_s30 = smov 0   ;;  %s1831_s10 = smov 0  }
   0x9   :  { %s1833_s11 = smov 0   ;;  %s1835_s12 = smov 0  }
   0xa LB: > { %s1848_s13 = sadd.s32 4294967295, %s1764_s12   ;;  %p47_p0 = scmp.ne.s32.totalorder %s1756_s10, %s1752_s30  ;;  %s1764_s12 = sphi %s1835_s12, %s2162_s12   ;;  %s1760_s11 = sphi %s1833_s11, %s2161_s11   ;;  %s1756_s10 = sphi %s1831_s10, %s2160_s10   ;;  %s1752_s30 = sphi %s1829_s30, %s2159_s30  }
   0xb   : > { %p48_p1 = scmp.eq.s32.totalorder %s1848_s13, 0  ;;  %p1295_p2 = scmp.ge.s32.totalorder %s1764_s12, 1 }
   0xc   : > { %p247_p3 = scmp.lt.s32.totalorder %s1764_s12, 3  ;;  %p1296_p4 = scmp.ne.s32.totalorder %s1848_s13, 0 }
   0xd   : > { %p1857_p5 = por %p48_p1, %p47_p0  ;;  %s2154_s1 = sld [smem:[#allocation21_spill]] }
   0xe   : > { %p1864_p6 = pnand %p1295_p2, %p247_p3  ;;  %s1766_s19 = smov [#allocation8]  }
   0xf   : > { %s260_s20 = sshll.u32 %s1766_s19, 4  ;;  %s2157_s2 = sld [smem:[#allocation22_spill]]  ;;  %s261_s20 = int_to_ptr.vmem [resolvable:$true] %s260_s20 }
  0x10   : > { %p1394_p7 = pneg %p1864_p6  ;;  %s1767_s25 = smov 64  }
  0x11   : > { %s1768_s26 = smov 4   ;;  %s1769_s27 = smov [#allocation10]  }
  0x12   : > { %p1872_p8 = pnand %p1394_p7, %p48_p1  ;;  %s274_s28 = sshll.u32 %s1769_s27, 4  ;;  %s275_s28 = int_to_ptr.vmem [resolvable:$true] %s274_s28 }
  0x13   : > { %s258_s17 = sshll.u32 %s2154_s1, 4  ;;  %s292_s15 = sshll.u32 %s2146_s5, 4  ;;  %s259_s17 = int_to_ptr.hbm [resolvable:$true] %s258_s17  ;;  %s293_s15 = int_to_ptr.hbm [resolvable:$true] %s292_s15 }
  0x14   : > { %1397 = dma.hbm_to_vmem [thread:$0]  (!%p1872_p8), %s259_s17, 256, %s261_s20, [#allocation9], %s1767_s25, %s1767_s25, %s1768_s26  }
  0x15   : > { %s272_s24 = sshll.u32 %s2157_s2, 4  ;;  %s1770_s16 = smov [#allocation11]   ;;  %s273_s24 = int_to_ptr.hbm [resolvable:$true] %s272_s24 }
  0x16   : > { %1400 = dma.hbm_to_vmem [thread:$0]  (!%p1872_p8), %s273_s24, 256, %s275_s28, [#allocation9], %s1767_s25, %s1767_s25, %s1768_s26  }
  0x17   : > { %s294_s17 = sshll.u32 %s1770_s16, 4  ;;  %s1893_s19 = sadd.s32 1, %s1764_s12   ;;  %s295_s17 = int_to_ptr.vmem [resolvable:$true] %s294_s17 }
  0x18   : > { %1403 = dma.hbm_to_vmem [thread:$0]  (!%p1872_p8), %s293_s15, 256, %s295_s17, [#allocation12], %s1767_s25, %s1767_s25, %s1768_s26  }
  0x19   : > { %s31_s20 = ssub.s32 %s1764_s12, %s1893_s19  ;;  %s34_s22 = sadd.s32 1, %s1760_s11 }
  0x1a   : > { %p32_p9 = scmp.eq.s32.totalorder %s31_s20, 0  ;;  %p41_p10 = scmp.ne.s32.totalorder %s1760_s11, %s1756_s10 }
  0x1b   : > { %p42_p11 = scmp.eq.s32.totalorder %s1764_s12, 0  ;;  %p1411_p12 = scmp.lt.s32.totalorder %s1764_s12, 2 }
  0x1c   : > { %s1908_s23 = scalar_select %p32_p9, %s1760_s11, %s34_s22  }
  0x1d   : > { %p43_p13 = por %p42_p11, %p41_p10  ;;  %s314_s24 = sand.u32 1, %s1760_s11  }
  0x1e   : > { %s1300_s27 = sshll.u32 %s314_s24, 3  ;;  %s1364_s28 = sshll.u32 %s1764_s12, 3 }
  0x1f   : > { %s323_s21 = scalar_lea.hbm %s2141_s0, %s1364_s28  ;;  %s318_s16 = scalar_lea.vmem [#allocation5], %s1300_s27 }
  0x20   : > { %s326_s1 = sshll.u32 %s318_s16, 4  ;;  %s324_s2 = sshll.u32 %s323_s21, 4  ;;  %s327_s1 = int_to_ptr.vmem [resolvable:$true] %s326_s1  ;;  %s325_s2 = int_to_ptr.hbm [resolvable:$true] %s324_s2 }
  0x21   : > { %p1915_p0 = pnand %p1411_p12, %p43_p13  ;;  %s315_s17 = scalar_lea.sflag [#allocation6], %s314_s24 }
  0x22   : > { %s1628_s20 = sshra.s32 %s325_s2, 4  ;;  %s1635_s28 = scalar_lea.hbm %s2141_s0, 16  ;;  %s1629_s20 = int_to_ptr.hbm [resolvable:$true] %s1628_s20 }
  0x23   : > { %s1630_s22 = scalar_lea.hbm %s1629_s20, 8  ;;  %p1632_p3 = pneg %p1915_p0 }
  0x24   : > { %p1631_p2 = scmp.ne.s32.totalorder %s1629_s20, %s1630_s22  ;;  %p1636_p9 = scmp.lt.s32.totalorder %s1629_s20, %s2141_s0 }
  0x25   : > { %p1637_p10 = scmp.lt.s32.totalorder %s1635_s28, %s1630_s22 }
  0x26   : > { %p1633_p7 = pnand %p1632_p3, %p1631_p2 }
  0x27   : > { %p1638_p11 = por %p1637_p10, %p1636_p9 }
  0x28   : > { %p1634_p8 = pneg %p1633_p7 }
  0x2a   : > { %p1639_p12 = pnand %p1638_p11, %p1634_p8 }
  0x2c   : > { %1642 = shalt.err (!%p1639_p12)
}
  0x2d   : > { %1407 = dma.hbm_to_vmem [thread:$0]  (!%p1915_p0), %s325_s2, 128, %s327_s1, %s315_s17, %s1767_s25, %s1767_s25, %s1768_s26  }
  0x2e   : > { %338 = sbr.rel (%p1864_p6) target bundleno = 5172 (0x1434), region = 52  ;;  %s340_s24 = sand.u32 (!%p1864_p6), 1, %s1756_s10  }
  0x2f   : > { %s1304_s21 = sshll.u32 (!%p1864_p6), %s340_s24, 3  ;;  %s341_s16 = scalar_lea.sflag (!%p1864_p6), [#allocation6], %s340_s24 }
  0x30   : > { %s344_s12 = scalar_lea.vmem (!%p1864_p6), [#allocation5], %s1304_s21 }
  0x33   : > { %1731 = dma.done.wait (%p1857_p5), %s341_s16, 128  }
  0x34   : > { %1733 = vsyncadd (%p1857_p5), %s341_s16, 4294967168 }
  0x35   : > { %1735 = dma.done.wait (%p48_p1), [#allocation9], 512  }
  0x36   : > { %1737 = vsyncadd (%p48_p1), [#allocation9], 4294966784 }
  0x37   : > { %1739 = dma.done.wait (%p48_p1), [#allocation12], 256  }
  0x38   : > { %1741 = vsyncadd (%p48_p1), [#allocation12], 4294967040  ;;  %395 = sbr.rel (%p1296_p4) target bundleno = 65 (0x41), region = 72 }
  0x3d   : > { %vm396_vm0 = vcmask 254976   ;;  %v1771_v0 = vmov 0.0  }
  0x3e   : > { %397 = vst.msk [vmem:[#allocation2] sm:$0x3] %vm396_vm0, %v1771_v0 }
  0x3f   : > { %398 = vst.msk [vmem:[#allocation3] sm:$0x3] %vm396_vm0, %v1771_v0 }
  0x40   : > { %399 = vst.msk [vmem:[#allocation4] sm:$0x3] %vm396_vm0, %v1771_v0 }
  0x41 PF: > { %v1367_v1 = vld [vmem:[#allocation8 + $0x8] sm:$0xff]  ;;  %v1369_v2 = vld [vmem:[#allocation10 + $0x8] sm:$0xff]  ;;  %v1366_v3 = vld [vmem:[#allocation8] sm:$0xff]  ;;  %vm427_vm1 = vcmask 261120   ;;  %s1772_s14 = smov 64   ;;  %s1773_s18 = smov 32  }
  0x42   : > { %437 = vmatpush.bf16.msra.mxu0 %v1367_v1  ;;  %477 = vmatpush.bf16.msra.mxu1 %v1369_v2  ;;  %v1368_v4 = vld [vmem:[#allocation10] sm:$0xff]  ;;  %v1954_v8 = vld [vmem:[%s2144_s3] ss:$0 sm:$0xff]  ;;  %s2031_s25 = sshll.u32 %s1848_s13, 3  ;;  %s1775_s20 = smov 96  }
  0x43   : > { %551 = vmatpush.bf16.msra.mxu2 %v1369_v2  ;;  %634 = vmatpush.bf16.msra.mxu3 %v1369_v2  ;;  %v1365_v6 = vld [vmem:[%s344_s12] sm:$0xff]  ;;  %s602_s17 = sadd.s32 1, %s2031_s25  ;;  %s685_s22 = sadd.s32 2, %s2031_s25 }
  0x44   : > { %s764_s27 = sadd.s32 3, %s2031_s25  ;;  %s840_s28 = sadd.s32 4, %s2031_s25 }
  0x45   : > { %v452_v5 = vld [vmem:[#allocation2] sm:$0x3]  ;;  %s917_s29 = sadd.s32 5, %s2031_s25  ;;  %s1000_s30 = sadd.s32 6, %s2031_s25 }
  0x46   : > { %v455_v7 = vpack.c.bf16 %v452_v5, %v452_v5  ;;  %438 = vmatpush.bf16.msra.mxu0 %v1366_v3  ;;  %478 = vmatpush.bf16.msra.mxu1 %v1368_v4  ;;  %v453_v15 = vld [vmem:[#allocation3] sm:$0x3]  ;;  %s1079_s24 = sadd.s32 7, %s2031_s25  ;;  %p1348_p1 = scmp.ne.s32.totalorder %s1848_s13, 1 }
  0x47   : > { %552 = vmatpush.bf16.msra.mxu2 %v1368_v4  ;;  %635 = vmatpush.bf16.msra.mxu3 %v1368_v4 }
  0x49   : > { %1321 = vmatmul.msk.bf16.vlgmr.msra.gmra.mxu0 %vm427_vm1, %v1365_v6  ;;  %1332 = vmatmul.msk.bf16.vlgmr.msra.gmra.mxu1 %vm427_vm1, %v455_v7 }
  0x4a   : > { %713 = vmatpush.bf16.msrb.mxu0 %v1369_v2  ;;  %792 = vmatpush.bf16.msrb.mxu1 %v1369_v2 }
  0x4b   : > { %866 = vmatpush.bf16.msrb.mxu2 %v1369_v2  ;;  %949 = vmatpush.bf16.msrb.mxu3 %v1369_v2 }
  0x4e   : > { %714 = vmatpush.bf16.msrb.mxu0 %v1368_v4  ;;  %793 = vmatpush.bf16.msrb.mxu1 %v1368_v4 }
  0x4f   : > { %867 = vmatpush.bf16.msrb.mxu2 %v1368_v4  ;;  %950 = vmatpush.bf16.msrb.mxu3 %v1368_v4 }
  0x52   : > { %1028 = vmatpush.bf16.msra.mxu0 %v1369_v2 }
  0x56   : > { %1029 = vmatpush.bf16.msra.mxu0 %v1368_v4 }
  0xc6   : > { %v440_v9 = vpop.f32.mrf.mxu0  ;;  %v480_v10 = vpop.f32.mrf.mxu1 }
  0xc7   : > { %v1957_v11 = vadd.f32 %v1954_v8, %v440_v9 }
  0xc9   : > { %v484_v12 = vadd.f32 %v480_v10, %v1957_v11 }
  0xcb   : > { %1468 = vtanh.f32 %v484_v12  ;;  %v1333_v16 = vmul.f32 -1.442695, %v484_v12 }
  0xcd   : > { %1470 = vpow2.f32 %v1333_v16 }
  0xce   : > { %v482_v13 = vpop.f32.mrf.mxu1 }
  0xd1   : > { %v1469_v14 = vpop.eup %1468 }
  0xd2   : > { %511 = vrot.lane.b32.xlu0 %v1469_v14, %s1772_s14 }
  0xd3   : > { %v1471_v17 = vpop.eup %1470 }
  0xd4   : > { %v488_v18 = vadd.f32 1.0, %v1471_v17 }
  0xd6   : > { %1472 = vrcp.f32 %v488_v18  ;;  %v500_v24 = vand.u32 2147483648, %v488_v18  ;;  %vm494_vm3 = vweird.f32 %v488_v18  ;;  %v498_v25 = vand.u32 2147483647, %v488_v18 }
  0xd8   : > { %v501_v27 = vor.u32 1.1754944e-38, %v500_v24  ;;  %vm499_vm5 = vcmp.eq.f32.partialorder %v498_v25, 8.507059e+37 }
  0xda   : > { %506 = vrot.lane.b32.xlu0 %v453_v15, %s1773_s18 }
  0xdc   : > { %v1473_v19 = vpop.eup %1472 }
  0xdd   : > { %v490_v20 = vmul.f32 %v1473_v19, %v488_v18  ;;  %vm495_vm2 = vweird.f32 %v1473_v19 }
  0xde   : > { %vm496_vm4 = vmor %vm494_vm3, %vm495_vm2 }
  0xdf   : > { %v491_v21 = vsub.f32 1.0, %v490_v20 }
  0xe1   : > { %v492_v22 = vmul.f32 %v1473_v19, %v491_v21 }
  0xe3   : > { %v493_v23 = vadd.f32 %v1473_v19, %v492_v22 }
  0xe5   : > { %v497_v26 = vsel %vm496_vm4, %v1473_v19, %v493_v23 }
  0xe6   : > { %v502_v29 = vsel %vm499_vm5, %v501_v27, %v497_v26 }
 0x144   : > { %v512_v28 = vpop.permute.xlu0 %511 }
 0x145   : > { %v514_v30 = vmul.f32 %v512_v28, %v502_v29 }
 0x147   : > { %516 = vrot.lane.b32.xlu1 %v514_v30, %s1773_s18 }
 0x14c   : > { %v507_v31 = vpop.permute.xlu0 %506 }
 0x14d   : > { %v509_v32 = vmul.f32 %v507_v31, %v502_v29 }
 0x1b9   : > { %v517_v33 = vpop.permute.xlu1 %516 }
 0x1ba   : > { %v519_v34 = vadd.f32 %v517_v33, %v509_v32 }
 0x1bc   : > { %1474 = vtanh.f32 %v519_v34  ;;  %v583_v60 = vrot.slane %v519_v34, 6 }
 0x1c2   : > { %v1475_v35 = vpop.eup %1474 }
 0x1c3   : > { %522 = vrot.lane.b32.xlu1 %v1475_v35, %s1772_s14 }
 0x235   : > { %v523_v36 = vpop.permute.xlu1 %522 }
 0x236   : > { %v1964_v37 = vmul.f32 %v523_v36, %v502_v29 }
 0x238   : > { %v538_v38 = vpack.c.bf16 %v1964_v37, %v1964_v37 }
 0x23a   : > { %540 = vrot.lane.b32.xlu2 %v538_v38, %s1773_s18 }
 0x294   : > { %v541_v39 = vpop.permute.xlu2 %540 }
 0x295   : > { %1334 = vmatmul.msk.bf16.vlgmr.msra.gmra.mxu2 %vm427_vm1, %v541_v39  ;;  %v442_v39 = vpop.f32.mrf.mxu0 }
 0x318   : > { %v554_v40 = vpop.f32.mrf.mxu2 }
 0x319   : > { %v559_v41 = vrot.slane %v554_v40, 6 }
 0x31b   : > { %v561_v42 = vadd.f32 %v559_v41, %v1957_v11 }
 0x31d   : > { %1476 = vtanh.f32 %v561_v42  ;;  %v1335_v45 = vmul.f32 -1.442695, %v561_v42 }
 0x31f   : > { %1478 = vpow2.f32 %v1335_v45 }
 0x320   : > { %v556_v43 = vpop.f32.mrf.mxu2 }
 0x323   : > { %v1477_v44 = vpop.eup %1476 }
 0x324   : > { %587 = vrot.lane.b32.xlu2 %v1477_v44, %s1772_s14 }
 0x325   : > { %v1479_v46 = vpop.eup %1478 }
 0x326   : > { %v565_v47 = vadd.f32 1.0, %v1479_v46 }
 0x328   : > { %1480 = vrcp.f32 %v565_v47  ;;  %v577_v53 = vand.u32 2147483648, %v565_v47  ;;  %vm571_vm7 = vweird.f32 %v565_v47  ;;  %v575_v54 = vand.u32 2147483647, %v565_v47 }
 0x32a   : > { %v578_v56 = vor.u32 1.1754944e-38, %v577_v53  ;;  %vm576_vm9 = vcmp.eq.f32.partialorder %v575_v54, 8.507059e+37 }
 0x32e   : > { %v1481_v48 = vpop.eup %1480 }
 0x32f   : > { %v567_v49 = vmul.f32 %v1481_v48, %v565_v47  ;;  %vm572_vm6 = vweird.f32 %v1481_v48 }
 0x330   : > { %vm573_vm8 = vmor %vm571_vm7, %vm572_vm6 }
 0x331   : > { %v568_v50 = vsub.f32 1.0, %v567_v49 }
 0x333   : > { %v569_v51 = vmul.f32 %v1481_v48, %v568_v50 }
 0x335   : > { %v570_v52 = vadd.f32 %v1481_v48, %v569_v51 }
 0x337   : > { %v574_v55 = vsel %vm573_vm8, %v1481_v48, %v570_v52 }
 0x338   : > { %v579_v58 = vsel %vm576_vm9, %v578_v56, %v574_v55 }
 0x339   : > { %v585_v61 = vmul.f32 %v583_v60, %v579_v58 }
 0x37e   : > { %v588_v57 = vpop.permute.xlu2 %587 }
 0x37f   : > { %v590_v59 = vmul.f32 %v588_v57, %v579_v58 }
 0x381   : > { %592 = vrot.lane.b32.xlu0 %v590_v59, %s1773_s18 }
 0x3f3   : > { %v593_v62 = vpop.permute.xlu0 %592 }
 0x3f4   : > { %v595_v63 = vadd.f32 %v593_v62, %v585_v61 }
 0x3f6   : > { %1482 = vtanh.f32 %v595_v63  ;;  %v666_v28 = vrot.slane %v595_v63, 6 }
 0x3fc   : > { %v1483_v0 = vpop.eup %1482 }
 0x3fd   : > { %598 = vrot.lane.b32.xlu1 %v1483_v0, %s1772_s14 }
 0x46f   : > { %v599_v1 = vpop.permute.xlu1 %598 }
 0x470   : > { %v1974_v2 = vmul.f32 %v599_v1, %v579_v58 }
 0x472   : > { %v620_v3 = vpack.c.bf16 %v1974_v2, %v1974_v2 }
 0x474   : > { %v622_v4 = vrot.slane %v620_v3, 1 }
 0x476   : > { %623 = vrot.lane.b32.xlu2 %v622_v4, %s1773_s18 }
 0x4d0   : > { %v624_v5 = vpop.permute.xlu2 %623 }
 0x4d1   : > { %1336 = vmatmul.msk.bf16.vlgmr.msra.gmra.mxu3 %vm427_vm1, %v624_v5 }
 0x554   : > { %v637_v6 = vpop.f32.mrf.mxu3 }
 0x555   : > { %v642_v7 = vrot.slane %v637_v6, 4  ;;  %v2001_v6 = vadd.f32 %v1954_v8, %v442_v39 }
 0x557   : > { %v644_v9 = vadd.f32 %v642_v7, %v1957_v11 }
 0x559   : > { %1484 = vtanh.f32 %v644_v9  ;;  %v1337_v13 = vmul.f32 -1.442695, %v644_v9 }
 0x55b   : > { %1486 = vpow2.f32 %v1337_v13 }
 0x55c   : > { %v639_v10 = vpop.f32.mrf.mxu3 }
 0x55f   : > { %v1485_v12 = vpop.eup %1484 }
 0x560   : > { %670 = vrot.lane.b32.xlu0 %v1485_v12, %s1772_s14 }
 0x561   : > { %v1487_v14 = vpop.eup %1486 }
 0x562   : > { %v648_v15 = vadd.f32 1.0, %v1487_v14 }
 0x564   : > { %1488 = vrcp.f32 %v648_v15  ;;  %v660_v21 = vand.u32 2147483648, %v648_v15  ;;  %vm654_vm11 = vweird.f32 %v648_v15  ;;  %v658_v22 = vand.u32 2147483647, %v648_v15 }
 0x566   : > { %v661_v24 = vor.u32 1.1754944e-38, %v660_v21  ;;  %vm659_vm13 = vcmp.eq.f32.partialorder %v658_v22, 8.507059e+37 }
 0x56a   : > { %v1489_v16 = vpop.eup %1488 }
 0x56b   : > { %v650_v17 = vmul.f32 %v1489_v16, %v648_v15  ;;  %vm655_vm10 = vweird.f32 %v1489_v16 }
 0x56c   : > { %vm656_vm12 = vmor %vm654_vm11, %vm655_vm10 }
 0x56d   : > { %v651_v18 = vsub.f32 1.0, %v650_v17 }
 0x56f   : > { %v652_v19 = vmul.f32 %v1489_v16, %v651_v18 }
 0x571   : > { %v653_v20 = vadd.f32 %v1489_v16, %v652_v19 }
 0x573   : > { %v657_v23 = vsel %vm656_vm12, %v1489_v16, %v653_v20 }
 0x574   : > { %v662_v26 = vsel %vm659_vm13, %v661_v24, %v657_v23 }
 0x575   : > { %v668_v29 = vmul.f32 %v666_v28, %v662_v26 }
 0x5d2   : > { %v671_v25 = vpop.permute.xlu0 %670 }
 0x5d3   : > { %v673_v27 = vmul.f32 %v671_v25, %v662_v26 }
 0x5d5   : > { %675 = vrot.lane.b32.xlu1 %v673_v27, %s1773_s18 }
 0x647   : > { %v676_v30 = vpop.permute.xlu1 %675 }
 0x648   : > { %v678_v31 = vadd.f32 %v676_v30, %v668_v29 }
 0x64a   : > { %1490 = vtanh.f32 %v678_v31  ;;  %v745_v59 = vrot.slane %v678_v31, 6 }
 0x650   : > { %v1491_v32 = vpop.eup %1490 }
 0x651   : > { %681 = vrot.lane.b32.xlu2 %v1491_v32, %s1772_s14 }
 0x6ab   : > { %v682_v33 = vpop.permute.xlu2 %681 }
 0x6ac   : > { %v1984_v34 = vmul.f32 %v682_v33, %v662_v26 }
 0x6ae   : > { %v699_v35 = vpack.c.bf16 %v1984_v34, %v1984_v34 }
 0x6b0   : > { %v701_v36 = vrot.slane %v699_v35, 2 }
 0x6b2   : > { %702 = vrot.lane.b32.xlu0 %v701_v36, %s1773_s18 }
 0x724   : > { %v703_v38 = vpop.permute.xlu0 %702 }
 0x725   : > { %1338 = vmatmul.msk.bf16.vlgmr.msrb.gmra.mxu0 %vm427_vm1, %v703_v38 }
 0x7a2   : > { %v716_v40 = vpop.f32.mrf.mxu0 }
 0x7a3   : > { %v721_v41 = vrot.slane %v716_v40, 2 }
 0x7a5   : > { %v723_v42 = vadd.f32 %v721_v41, %v1957_v11 }
 0x7a7   : > { %1492 = vtanh.f32 %v723_v42  ;;  %v1339_v45 = vmul.f32 -1.442695, %v723_v42 }
 0x7a9   : > { %1494 = vpow2.f32 %v1339_v45 }
 0x7aa   : > { %v718_v43 = vpop.f32.mrf.mxu0 }
 0x7ad   : > { %v1493_v44 = vpop.eup %1492 }
 0x7ae   : > { %749 = vrot.lane.b32.xlu1 %v1493_v44, %s1772_s14 }
 0x7af   : > { %v1495_v46 = vpop.eup %1494 }
 0x7b0   : > { %v727_v47 = vadd.f32 1.0, %v1495_v46 }
 0x7b2   : > { %1496 = vrcp.f32 %v727_v47  ;;  %v739_v53 = vand.u32 2147483648, %v727_v47  ;;  %vm733_vm15 = vweird.f32 %v727_v47  ;;  %v737_v54 = vand.u32 2147483647, %v727_v47 }
 0x7b4   : > { %v740_v55 = vor.u32 1.1754944e-38, %v739_v53  ;;  %vm738_vm2 = vcmp.eq.f32.partialorder %v737_v54, 8.507059e+37 }
 0x7b8   : > { %v1497_v48 = vpop.eup %1496 }
 0x7b9   : > { %v729_v49 = vmul.f32 %v1497_v48, %v727_v47  ;;  %vm734_vm14 = vweird.f32 %v1497_v48 }
 0x7ba   : > { %vm735_vm0 = vmor %vm733_vm15, %vm734_vm14 }
 0x7bb   : > { %v730_v50 = vsub.f32 1.0, %v729_v49 }
 0x7bd   : > { %v731_v51 = vmul.f32 %v1497_v48, %v730_v50 }
 0x7bf   : > { %v732_v52 = vadd.f32 %v1497_v48, %v731_v51 }
 0x7c1   : > { %v736_v11 = vsel %vm735_vm0, %v1497_v48, %v732_v52 }
 0x7c2   : > { %v741_v57 = vsel %vm738_vm2, %v740_v55, %v736_v11 }
 0x7c3   : > { %v747_v60 = vmul.f32 %v745_v59, %v741_v57 }
 0x820   : > { %v750_v56 = vpop.permute.xlu1 %749 }
 0x821   : > { %v752_v58 = vmul.f32 %v750_v56, %v741_v57 }
 0x823   : > { %754 = vrot.lane.b32.xlu2 %v752_v58, %s1773_s18 }
 0x87d   : > { %v755_v61 = vpop.permute.xlu2 %754 }
 0x87e   : > { %v757_v62 = vadd.f32 %v755_v61, %v747_v60 }
 0x880   : > { %1498 = vtanh.f32 %v757_v62  ;;  %v821_v27 = vrot.slane %v757_v62, 6 }
 0x886   : > { %v1499_v63 = vpop.eup %1498 }
 0x887   : > { %760 = vrot.lane.b32.xlu0 %v1499_v63, %s1772_s14 }
 0x8f9   : > { %v761_v0 = vpop.permute.xlu0 %760 }
 0x8fa   : > { %v1994_v1 = vmul.f32 %v761_v0, %v741_v57 }
 0x8fc   : > { %v778_v3 = vpack.c.bf16 %v1994_v1, %v1994_v1 }
 0x8fe   : > { %v780_v4 = vrot.slane %v778_v3, 3 }
 0x900   : > { %781 = vrot.lane.b32.xlu1 %v780_v4, %s1773_s18 }
 0x972   : > { %v782_v5 = vpop.permute.xlu1 %781 }
 0x973   : > { %1340 = vmatmul.msk.bf16.vlgmr.msrb.gmra.mxu1 %vm427_vm1, %v782_v5 }
 0x9f0   : > { %v795_v7 = vpop.f32.mrf.mxu1 }
 0x9f1   : > { %v799_v9 = vadd.f32 %v795_v7, %v2001_v6 }
 0x9f3   : > { %1500 = vtanh.f32 %v799_v9  ;;  %v1341_v13 = vmul.f32 -1.442695, %v799_v9 }
 0x9f5   : > { %1502 = vpow2.f32 %v1341_v13 }
 0x9f8   : > { %v797_v10 = vpop.f32.mrf.mxu1 }
 0x9f9   : > { %v1501_v12 = vpop.eup %1500 }
 0x9fa   : > { %825 = vrot.lane.b32.xlu2 %v1501_v12, %s1772_s14 }
 0x9fb   : > { %v1503_v14 = vpop.eup %1502 }
 0x9fc   : > { %v803_v15 = vadd.f32 1.0, %v1503_v14 }
 0x9fe   : > { %1504 = vrcp.f32 %v803_v15  ;;  %v815_v8 = vand.u32 2147483648, %v803_v15  ;;  %vm809_vm4 = vweird.f32 %v803_v15  ;;  %v813_v21 = vand.u32 2147483647, %v803_v15 }
 0xa00   : > { %v816_v23 = vor.u32 1.1754944e-38, %v815_v8  ;;  %vm814_vm6 = vcmp.eq.f32.partialorder %v813_v21, 8.507059e+37 }
 0xa04   : > { %v1505_v16 = vpop.eup %1504 }
 0xa05   : > { %v805_v17 = vmul.f32 %v1505_v16, %v803_v15  ;;  %vm810_vm3 = vweird.f32 %v1505_v16 }
 0xa06   : > { %vm811_vm5 = vmor %vm809_vm4, %vm810_vm3 }
 0xa07   : > { %v806_v18 = vsub.f32 1.0, %v805_v17 }
 0xa09   : > { %v807_v19 = vmul.f32 %v1505_v16, %v806_v18 }
 0xa0b   : > { %v808_v20 = vadd.f32 %v1505_v16, %v807_v19 }
 0xa0d   : > { %v812_v22 = vsel %vm811_vm5, %v1505_v16, %v808_v20 }
 0xa0e   : > { %v817_v25 = vsel %vm814_vm6, %v816_v23, %v812_v22 }
 0xa0f   : > { %v823_v28 = vmul.f32 %v821_v27, %v817_v25 }
 0xa54   : > { %v826_v24 = vpop.permute.xlu2 %825 }
 0xa55   : > { %v828_v26 = vmul.f32 %v826_v24, %v817_v25 }
 0xa57   : > { %830 = vrot.lane.b32.xlu0 %v828_v26, %s1773_s18 }
 0xac9   : > { %v831_v29 = vpop.permute.xlu0 %830 }
 0xaca   : > { %v833_v30 = vadd.f32 %v831_v29, %v823_v28 }
 0xacc   : > { %1506 = vtanh.f32 %v833_v30  ;;  %v898_v57 = vrot.slane %v833_v30, 6 }
 0xad2   : > { %v1507_v31 = vpop.eup %1506 }
 0xad3   : > { %836 = vrot.lane.b32.xlu1 %v1507_v31, %s1772_s14 }
 0xb45   : > { %v837_v32 = vpop.permute.xlu1 %836 }
 0xb46   : > { %v2007_v33 = vmul.f32 %v837_v32, %v817_v25  ;;  %v449_v32 = vld [vmem:[%s2145_s4] sm:$0x3] }
 0xb48   : > { %v853_v35 = vpack.c.bf16 %v2007_v33, %v2007_v33 }
 0xb4a   : > { %855 = vrot.lane.b32.xlu2 %v853_v35, %s1773_s18  ;;  %v526_v35 = vstv %s2031_s25 }
 0xba4   : > { %v856_v36 = vpop.permute.xlu2 %855 }
 0xba5   : > { %1342 = vmatmul.msk.bf16.vlgmr.msrb.gmra.mxu2 %vm427_vm1, %v856_v36  ;;  %v1774_v36 = vmov 0  }
 0xba6   : > { %1464 = vset.pattern.permute.xlu0 %v1774_v36  ;;  %1465 = vset.pattern.permute.xlu1 %v1774_v36 }
 0xba7   : > { %1466 = vset.pattern.permute.xlu2 %v1774_v36 }
 0xc28   : > { %v869_v38 = vpop.f32.mrf.mxu2 }
 0xc29   : > { %v874_v39 = vrot.slane %v869_v38, 6  ;;  %v2038_v38 = vadd.s32 4294967295, %v449_v32 }
 0xc2b   : > { %v876_v40 = vadd.f32 %v874_v39, %v2001_v6  ;;  %vm527_vm15 = vcmp.eq.s32.totalorder %v2038_v38, %v526_v35 }
 0xc2c   : > { %v528_v39 = vsel %vm527_vm15, 1, %v1774_v36 }
 0xc2d   : > { %1508 = vtanh.f32 %v876_v40  ;;  %v1343_v43 = vmul.f32 -1.442695, %v876_v40 }
 0xc2f   : > { %1510 = vpow2.f32 %v1343_v43 }
 0xc30   : > { %v871_v41 = vpop.f32.mrf.mxu2 }
 0xc33   : > { %v1509_v42 = vpop.eup %1508 }
 0xc34   : > { %902 = vrot.lane.b32.xlu0 %v1509_v42, %s1772_s14 }
 0xc35   : > { %v1511_v44 = vpop.eup %1510 }
 0xc36   : > { %v880_v45 = vadd.f32 1.0, %v1511_v44  ;;  %v454_v44 = vld [vmem:[#allocation4] sm:$0x3] }
 0xc38   : > { %1512 = vrcp.f32 %v880_v45  ;;  %v892_v51 = vand.u32 2147483648, %v880_v45  ;;  %vm886_vm8 = vweird.f32 %v880_v45  ;;  %v890_v52 = vand.u32 2147483647, %v880_v45 }
 0xc3a   : > { %v893_v54 = vor.u32 1.1754944e-38, %v892_v51  ;;  %vm891_vm10 = vcmp.eq.f32.partialorder %v890_v52, 8.507059e+37 }
 0xc3e   : > { %v1513_v46 = vpop.eup %1512 }
 0xc3f   : > { %v882_v47 = vmul.f32 %v1513_v46, %v880_v45  ;;  %vm887_vm7 = vweird.f32 %v1513_v46  ;;  %v603_v45 = vstv %s602_s17 }
 0xc40   : > { %vm888_vm9 = vmor %vm886_vm8, %vm887_vm7  ;;  %vm604_vm0 = vcmp.eq.s32.totalorder %v2038_v38, %v603_v45 }
 0xc41   : > { %v883_v48 = vsub.f32 1.0, %v882_v47  ;;  %v686_v47 = vstv %s685_s22 }
 0xc42   : > { %vm687_vm2 = vcmp.eq.s32.totalorder %v2038_v38, %v686_v47  ;;  %v1080_v47 = vstv %s1079_s24 }
 0xc43   : > { %v884_v49 = vmul.f32 %v1513_v46, %v883_v48  ;;  %v688_v48 = vsel %vm687_vm2, 1, %v1774_v36  ;;  %vm1096_vm2 = vcmask 261126  }
 0xc45   : > { %v885_v50 = vadd.f32 %v1513_v46, %v884_v49  ;;  %v773_v49 = vrot.slane %v1994_v1, 6 }
 0xc47   : > { %v889_v53 = vsel %vm888_vm9, %v1513_v46, %v885_v50  ;;  %v605_v46 = vsel %vm604_vm0, 1, %v1774_v36  ;;  %vm1081_vm0 = vcmp.eq.s32.totalorder %v2038_v38, %v1080_v47 }
 0xc48   : > { %v894_v55 = vsel %vm891_vm10, %v893_v54, %v889_v53  ;;  %v765_v54 = vstv %s764_s27 }
 0xc49   : > { %v900_v58 = vmul.f32 %v898_v57, %v894_v55  ;;  %vm766_vm4 = vcmp.eq.s32.totalorder %v2038_v38, %v765_v54 }
 0xca6   : > { %v903_v11 = vpop.permute.xlu0 %902 }
 0xca7   : > { %v905_v56 = vmul.f32 %v903_v11, %v894_v55  ;;  %v767_v11 = vsel %vm766_vm4, 1, %v1774_v36 }
 0xca9   : > { %907 = vrot.lane.b32.xlu1 %v905_v56, %s1773_s18 }
 0xd1b   : > { %v908_v59 = vpop.permute.xlu1 %907 }
 0xd1c   : > { %v910_v60 = vadd.f32 %v908_v59, %v900_v58  ;;  %v611_v59 = vrot.slane %v1974_v2, 2 }
 0xd1e   : > { %1514 = vtanh.f32 %v910_v60  ;;  %v981_v27 = vrot.slane %v910_v60, 6 }
 0xd24   : > { %v1515_v61 = vpop.eup %1514 }
 0xd25   : > { %913 = vrot.lane.b32.xlu2 %v1515_v61, %s1772_s14 }
 0xd7f   : > { %v914_v62 = vpop.permute.xlu2 %913 }
 0xd80   : > { %v2017_v63 = vmul.f32 %v914_v62, %v894_v55 }
 0xd82   : > { %v935_v0 = vpack.c.bf16 %v2017_v63, %v2017_v63 }
 0xd84   : > { %v937_v3 = vrot.slane %v935_v0, 1 }
 0xd86   : > { %938 = vrot.lane.b32.xlu0 %v937_v3, %s1773_s18 }
 0xdf8   : > { %v939_v4 = vpop.permute.xlu0 %938 }
 0xdf9   : > { %1344 = vmatmul.msk.bf16.vlgmr.msrb.gmra.mxu3 %vm427_vm1, %v939_v4 }
 0xe7c   : > { %v952_v5 = vpop.f32.mrf.mxu3 }
 0xe7d   : > { %v957_v7 = vrot.slane %v952_v5, 4 }
 0xe7f   : > { %v959_v9 = vadd.f32 %v957_v7, %v2001_v6 }
 0xe81   : > { %1516 = vtanh.f32 %v959_v9  ;;  %v1345_v13 = vmul.f32 -1.442695, %v959_v9 }
 0xe83   : > { %1518 = vpow2.f32 %v1345_v13 }
 0xe84   : > { %v954_v10 = vpop.f32.mrf.mxu3 }
 0xe87   : > { %v1517_v12 = vpop.eup %1516 }
 0xe88   : > { %985 = vrot.lane.b32.xlu1 %v1517_v12, %s1772_s14 }
 0xe89   : > { %v1519_v14 = vpop.eup %1518 }
 0xe8a   : > { %v963_v15 = vadd.f32 1.0, %v1519_v14  ;;  %v694_v14 = vrot.slane %v1984_v34, 4  ;;  %v1001_v34 = vstv %s1000_s30 }
 0xe8c   : > { %1520 = vrcp.f32 %v963_v15  ;;  %v975_v8 = vand.u32 2147483648, %v963_v15  ;;  %vm969_vm12 = vweird.f32 %v963_v15  ;;  %v973_v21 = vand.u32 2147483647, %v963_v15 }
 0xe8e   : > { %v976_v23 = vor.u32 1.1754944e-38, %v975_v8  ;;  %vm974_vm14 = vcmp.eq.f32.partialorder %v973_v21, 8.507059e+37 }
 0xe92   : > { %v1521_v16 = vpop.eup %1520 }
 0xe93   : > { %v965_v17 = vmul.f32 %v1521_v16, %v963_v15  ;;  %vm970_vm11 = vweird.f32 %v1521_v16  ;;  %v841_v15 = vstv %s840_s28 }
 0xe94   : > { %vm971_vm13 = vmor %vm969_vm12, %vm970_vm11  ;;  %vm842_vm9 = vcmp.eq.s32.totalorder %v2038_v38, %v841_v15  ;;  %vm1002_vm11 = vcmp.eq.s32.totalorder %v2038_v38, %v1001_v34 }
 0xe95   : > { %v966_v18 = vsub.f32 1.0, %v965_v17  ;;  %v918_v17 = vstv %s917_s29  ;;  %v1003_v8 = vsel %vm1002_vm11, 1, %v1774_v36 }
 0xe96   : > { %vm919_vm10 = vcmp.eq.s32.totalorder %v2038_v38, %v918_v17 }
 0xe97   : > { %v967_v19 = vmul.f32 %v1521_v16, %v966_v18  ;;  %v920_v18 = vsel %vm919_vm10, 1, %v1774_v36 }
 0xe99   : > { %v968_v20 = vadd.f32 %v1521_v16, %v967_v19 }
 0xe9b   : > { %v972_v22 = vsel %vm971_vm13, %v1521_v16, %v968_v20  ;;  %v843_v16 = vsel %vm842_vm9, 1, %v1774_v36 }
 0xe9c   : > { %v977_v25 = vsel %vm974_vm14, %v976_v23, %v972_v22 }
 0xe9d   : > { %v983_v28 = vmul.f32 %v981_v27, %v977_v25 }
 0xefa   : > { %v986_v24 = vpop.permute.xlu1 %985 }
 0xefb   : > { %v988_v26 = vmul.f32 %v986_v24, %v977_v25 }
 0xefd   : > { %990 = vrot.lane.b32.xlu2 %v988_v26, %s1773_s18 }
 0xf57   : > { %v991_v29 = vpop.permute.xlu2 %990 }
 0xf58   : > { %v2026_v30 = vadd.f32 %v991_v29, %v983_v28 }
 0xf5a   : > { %1522 = vtanh.f32 %v2026_v30  ;;  %v1060_v21 = vrot.slane %v2026_v30, 6 }
 0xf60   : > { %v1523_v31 = vpop.eup %1522 }
 0xf61   : > { %996 = vrot.lane.b32.xlu0 %v1523_v31, %s1772_s14 }
 0xf69   : > { %530 = vperm.xlu0 %1464, %v528_v39   ;;  %v926_v39 = vrot.slane %v2017_v63, 2  ;;  %v1082_v63 = vsel %vm1081_vm0, 1, %v1774_v36 }
 0xfd3   : > { %v997_v40 = vpop.permute.xlu0 %996 }
 0xfd4   : > { %v2044_v41 = vmul.f32 %v997_v40, %v977_v25 }
 0xfd6   : > { %v1014_v42 = vpack.c.bf16 %v2044_v41, %v2044_v41  ;;  %v1009_v40 = vrot.slane %v2044_v41, 4 }
 0xfd8   : > { %v1016_v43 = vrot.slane %v1014_v42, 2 }
 0xfda   : > { %1017 = vrot.lane.b32.xlu1 %v1016_v43, %s1773_s18 }
 0xfdb   : > { %v531_v51 = vpop.permute.xlu0 %530 }
 0xfdc   : > { %vm532_vm3 = vcmp.eq.s32.totalorder %v531_v51, 1 }
 0xfe2   : > { %534 = vrot.lane.b32.xlu1 %v454_v44, %s1775_s20 }
 0xfea   : > { %607 = vperm.xlu1 %1465, %v605_v46  }
 0xff2   : > { %690 = vperm.xlu1 %1465, %v688_v48  }
 0xffa   : > { %774 = vrot.lane.b32.xlu1 %v773_v49, %s1773_s18 }
0x104c   : > { %v1018_v50 = vpop.permute.xlu1 %1017 }
0x104d   : > { %1346 = vmatmul.msk.bf16.vlgmr.msra.gmra.mxu0 %vm427_vm1, %v1018_v50 }
0x1054   : > { %v535_v52 = vpop.permute.xlu1 %534 }
0x1055   : > { %v537_v53 = vsel %vm532_vm3, %v1964_v37, %v535_v52 }
0x1056   : > { %616 = vrot.lane.b32.xlu0 %v537_v53, %s1773_s18 }
0x105c   : > { %v608_v19 = vpop.permute.xlu1 %607 }
0x105d   : > { %vm609_vm12 = vcmp.eq.s32.totalorder %v608_v19, 1 }
0x105e   : > { %769 = vperm.xlu0 %1464, %v767_v11  }
0x1064   : > { %v691_v23 = vpop.permute.xlu1 %690 }
0x1065   : > { %vm692_vm13 = vcmp.eq.s32.totalorder %v691_v23, 1 }
0x106c   : > { %v775_v32 = vpop.permute.xlu1 %774 }
0x10c8   : > { %v617_v22 = vpop.permute.xlu0 %616 }
0x10ca   : > { %v1031_v1 = vpop.f32.mrf.mxu0 }
0x10cb   : > { %v1036_v55 = vrot.slane %v1031_v1, 2 }
0x10cd   : > { %v1038_v56 = vadd.f32 %v1036_v55, %v2001_v6 }
0x10cf   : > { %1524 = vtanh.f32 %v1038_v56  ;;  %v1347_v37 = vmul.f32 -1.442695, %v1038_v56 }
0x10d0   : > { %v770_v27 = vpop.permute.xlu0 %769 }
0x10d1   : > { %1526 = vpow2.f32 %v1347_v37  ;;  %vm771_vm14 = vcmp.eq.s32.totalorder %v770_v27, 1 }
0x10d2   : > { %v1033_v57 = vpop.f32.mrf.mxu0 }
0x10d5   : > { %v1525_v58 = vpop.eup %1524 }
0x10d6   : > { %1064 = vrot.lane.b32.xlu2 %v1525_v58, %s1772_s14 }
0x10d7   : > { %v1527_v60 = vpop.eup %1526 }
0x10d8   : > { %v1042_v61 = vadd.f32 1.0, %v1527_v60 }
0x10da   : > { %1528 = vrcp.f32 %v1042_v61  ;;  %v1054_v5 = vand.u32 2147483648, %v1042_v61  ;;  %vm1048_vm6 = vweird.f32 %v1042_v61  ;;  %v1052_v7 = vand.u32 2147483647, %v1042_v61 }
0x10dc   : > { %v1055_v9 = vor.u32 1.1754944e-38, %v1054_v5  ;;  %vm1053_vm8 = vcmp.eq.f32.partialorder %v1052_v7, 8.507059e+37 }
0x10de   : > { %612 = vrot.lane.b32.xlu2 %v611_v59, %s1773_s18 }
0x10e0   : > { %v1529_v62 = vpop.eup %1528 }
0x10e1   : > { %v1044_v0 = vmul.f32 %v1529_v62, %v1042_v61  ;;  %vm1049_vm5 = vweird.f32 %v1529_v62 }
0x10e2   : > { %vm1050_vm7 = vmor %vm1048_vm6, %vm1049_vm5  ;;  %vm1103_vm5 = vcmask 254976  }
0x10e3   : > { %v1045_v3 = vsub.f32 1.0, %v1044_v0 }
0x10e5   : > { %v1046_v4 = vmul.f32 %v1529_v62, %v1045_v3 }
0x10e7   : > { %v1047_v6 = vadd.f32 %v1529_v62, %v1046_v4 }
0x10e9   : > { %v1051_v2 = vsel %vm1050_vm7, %v1529_v62, %v1047_v6 }
0x10ea   : > { %v1056_v12 = vsel %vm1053_vm8, %v1055_v9, %v1051_v2 }
0x10eb   : > { %v1062_v24 = vmul.f32 %v1060_v21, %v1056_v12 }
0x1130   : > { %v1065_v10 = vpop.permute.xlu2 %1064 }
0x1131   : > { %v1067_v13 = vmul.f32 %v1065_v10, %v1056_v12 }
0x1133   : > { %1069 = vrot.lane.b32.xlu2 %v1067_v13, %s1773_s18 }
0x1138   : > { %v613_v20 = vpop.permute.xlu2 %612 }
0x1139   : > { %v619_v28 = vsel %vm609_vm12, %v613_v20, %v617_v22 }
0x113b   : > { %695 = vrot.lane.b32.xlu2 %v694_v14, %s1773_s18 }
0x1143   : > { %845 = vperm.xlu2 %1466, %v843_v16  }
0x114b   : > { %922 = vperm.xlu2 %1466, %v920_v18  }
0x1153   : > { %1005 = vperm.xlu2 %1466, %v1003_v8  }
0x118d   : > { %v1070_v25 = vpop.permute.xlu2 %1069 }
0x118e   : > { %v1072_v26 = vadd.f32 %v1070_v25, %v1062_v24 }
0x1190   : > { %1530 = vtanh.f32 %v1072_v26 }
0x1195   : > { %v696_v29 = vpop.permute.xlu2 %695 }
0x1196   : > { %v1531_v31 = vpop.eup %1530  ;;  %v698_v35 = vsel %vm692_vm13, %v696_v29, %v619_v28 }
0x1197   : > { %1075 = vrot.lane.b32.xlu0 %v1531_v31, %s1772_s14  ;;  %v777_v30 = vsel %vm771_vm14, %v775_v32, %v698_v35 }
0x1198   : > { %849 = vrot.lane.b32.xlu1 %v777_v30, %s1775_s20 }
0x119d   : > { %v846_v42 = vpop.permute.xlu2 %845 }
0x119e   : > { %vm847_vm15 = vcmp.eq.s32.totalorder %v846_v42, 1 }
0x119f   : > { %927 = vrot.lane.b32.xlu0 %v926_v39, %s1773_s18 }
0x11a5   : > { %v923_v49 = vpop.permute.xlu2 %922 }
0x11a6   : > { %vm924_vm3 = vcmp.eq.s32.totalorder %v923_v49, 1 }
0x11a7   : > { %1010 = vrot.lane.b32.xlu0 %v1009_v40, %s1773_s18 }
0x11ad   : > { %v1006_v52 = vpop.permute.xlu2 %1005 }
0x11ae   : > { %vm1007_vm4 = vcmp.eq.s32.totalorder %v1006_v52, 1 }
0x1209   : > { %v1076_v43 = vpop.permute.xlu0 %1075 }
0x120a   : > { %v1078_v44 = vmul.f32 %v1076_v43, %v1056_v12  ;;  %v850_v45 = vpop.permute.xlu1 %849 }
0x120b   : > { %v852_v46 = vsel %vm847_vm15, %v2007_v33, %v850_v45 }
0x120c   : > { %v1088_v48 = vrot.slane %v1078_v44, 6  ;;  %931 = vrot.lane.b32.xlu1 %v852_v46, %s1773_s18  ;;  %1093 = vrot.lane.b32.xlu0 %v1078_v44, %s1773_s18 }
0x120e   : > { %1089 = vrot.lane.b32.xlu2 %v1088_v48, %s1773_s18 }
0x1211   : > { %v928_v41 = vpop.permute.xlu0 %927 }
0x1214   : > { %1084 = vperm.xlu1 %1465, %v1082_v63  }
0x1219   : > { %v1011_v50 = vpop.permute.xlu0 %1010 }
0x121c   : > { %1099 = vrot.lane.b32.xlu1 %v1072_v26, %s1775_s20 }
0x1268   : > { %v1090_v38 = vpop.permute.xlu2 %1089 }
0x127e   : > { %v932_v33 = vpop.permute.xlu1 %931  ;;  %v1094_v51 = vpop.permute.xlu0 %1093 }
0x127f   : > { %1097 = vst.msk [vmem:[#allocation2 - $0x6] sm:$0xc0] %vm1096_vm2, %v1094_v51  ;;  %v934_v53 = vsel %vm924_vm3, %v928_v41, %v932_v33 }
0x1280   : > { %v1013_v11 = vsel %vm1007_vm4, %v1011_v50, %v934_v53 }
0x1286   : > { %v1085_v54 = vpop.permute.xlu1 %1084 }
0x1287   : > { %vm1086_vm6 = vcmp.eq.s32.totalorder %v1085_v54, 1 }
0x1288   : > { %v1092_v36 = vsel %vm1086_vm6, %v1090_v38, %v1013_v11 }
0x1289   : > { %1104 = vst.msk [vmem:[#allocation4] sm:$0x3] %vm1103_vm5, %v1092_v36 }
0x128b   : > { %1108 = sbr.rel (%p1348_p1) target bundleno = 5162 (0x142a), region = 76 }
0x128e   : > { %v1100_v1 = vpop.permute.xlu1 %1099 }
0x128f   : > { %1102 = vst.msk [vmem:[#allocation3 - $0x6] sm:$0xc0] %vm1096_vm2, %v1100_v1 }
0x1290   : > { %v1371_v55 = vld [vmem:[#allocation11 + $0x8] sm:$0xff]  ;;  %v1370_v56 = vld [vmem:[#allocation11] sm:$0xff]  ;;  %v1109_v57 = vpack.c.bf16 %v1092_v36, %v1092_v36  ;;  %v1776_v58 = vmov 0   ;;  %vm1147_vm7 = vcmask 1041408   ;;  %v1160_v2 = vlaneseq }
0x1291   : > { %1139 = vmatpush.bf16.msra.mxu0 %v1371_v55  ;;  %1532 = vset.pattern.permute.xlu0 %v1776_v58  ;;  %v1533_v59 = vld [vmem:[%s2147_s6] ss:$0 sm:$0xff]  ;;  %vm1180_vm8 = vcmask 0  }
0x1292   : > { %v1162_v0 = vld [vmem:[%s2148_s7] sm:$0x3]  ;;  %v1161_v9 = vand.u32 127, %v1160_v2 }
0x1295   : > { %1140 = vmatpush.bf16.msra.mxu0 %v1370_v56 }
0x1298   : > { %1357 = vmatmul.msk.bf16.vlgmr.msra.gmra.mxu0 %vm427_vm1, %v1109_v57 }
0x1315   : > { %v1142_v37 = vpop.f32.mrf.mxu0 }
0x1316   : > { %v1143_v60 = vadd.f32 %v1533_v59, %v1142_v37 }
0x1318   : > { %1146 = vst [vmem:[#allocation14] sm:$0x3] %v1143_v60  ;;  %v1148_v61 = vsel %vm1147_vm7, %v1143_v60, -inf }
0x1319   : > { %1149 = vmax.xlane.f32.xlu0 %v1148_v61 }
0x131d   : > { %v1144_v62 = vpop.f32.mrf.mxu0 }
0x132d   : > { %1164 = vperm.xlu0 %1532, %v1162_v0  }
0x138c   : > { %v1150_v3 = vpop.xlane.xlu0 %1149 }
0x138d   : > { %v1151_v4 = vsub.f32 %v1143_v60, %v1150_v3 }
0x138f   : > { %v1152_v6 = vmul.f32 1.442695, %v1151_v4 }
0x1391   : > { %1534 = vpow2.f32 %v1152_v6 }
0x1397   : > { %v1535_v5 = vpop.eup %1534 }
0x1398   : > { %v1154_v7 = vsel %vm1147_vm7, %v1535_v5, 0.0 }
0x1399   : > { %1155 = vadd.xlane.f32.xlu1 %v1154_v7 }
0x139f   : > { %v1165_v10 = vpop.permute.xlu0 %1164 }
0x13a0   : > { %vm1166_vm1 = vcmp.eq.s32.totalorder %v1161_v9, %v1165_v10 }
0x13a1   : > { %v1167_v12 = vsel %vm1166_vm1, %v1143_v60, 0.0 }
0x13a2   : > { %v1168_v13 = vsel %vm1147_vm7, %v1167_v12, 0.0 }
0x13a3   : > { %1169 = vadd.xlane.f32.xlu1 %v1168_v13 }
0x140c   : > { %v1156_v14 = vpop.xlane.xlu1 %1155 }
0x140d   : > { %1536 = vlog2.f32 %v1156_v14 }
0x1413   : > { %v1537_v15 = vpop.eup %1536 }
0x1414   : > { %v1158_v16 = vmul.f32 0.6931472, %v1537_v15 }
0x1416   : > { %v1159_v17 = vadd.f32 %v1158_v16, %v1150_v3  ;;  %v1170_v18 = vpop.xlane.xlu1 %1169 }
0x1418   : > { %v1171_v19 = vsub.f32 %v1159_v17, %v1170_v18 }
0x141a   : > { %v1172_v20 = vsel %vm1147_vm7, %v1171_v19, 0.0 }
0x141b   : > { %v1173_v34 = vrot.slane %v1172_v20, 4 }
0x141d   : > { %v1174_v8 = vadd.f32 %v1173_v34, %v1172_v20 }
0x141f   : > { %v1175_v21 = vrot.slane %v1174_v8, 2 }
0x1421   : > { %v1176_v22 = vadd.f32 %v1175_v21, %v1174_v8 }
0x1423   : > { %v1177_v23 = vrot.slane %v1176_v22, 1 }
0x1425   : > { %v1178_v24 = vadd.f32 %v1177_v23, %v1176_v22 }
0x1427   : > { %v1179_v25 = vmul.f32 0.5, %v1178_v24 }
0x1429   : > { %1181 = vst.msk [vmem:[#allocation13] sm:$0x1] %vm1180_vm8, %v1179_v25 }
0x142a PF: > { %p1415_p4 = scmp.eq.s32.totalorder %s1848_s13, 1  ;;  %s1777_s2 = smov [#allocation13]  }
0x142b   : > { %s1188_s14 = sshll.u32 %s1777_s2, 4  ;;  %s1190_s26 = sshll.u32 %s2149_s8, 4  ;;  %s1189_s14 = int_to_ptr.vmem [resolvable:$true] %s1188_s14  ;;  %s1191_s26 = int_to_ptr.hbm [resolvable:$true] %s1190_s26 }
0x142c   : > { %1387 = dma.vmem_to_hbm [thread:$0]  (%p1415_p4), %s1189_s14, 16, %s1191_s26, [#allocation7]  }
0x142d   : > { %s1202_s20 = sshll.u32 %s2150_s9, 4  ;;  %s1778_s22 = smov [#allocation14]   ;;  %s1203_s20 = int_to_ptr.hbm [resolvable:$true] %s1202_s20 }
0x142e   : > { %s1200_s27 = sshll.u32 %s1778_s22, 4  ;;  %s1201_s27 = int_to_ptr.vmem [resolvable:$true] %s1200_s27 }
0x142f   : > { %1389 = dma.vmem_to_hbm [thread:$0]  (%p1415_p4), %s1201_s27, 32, %s1203_s20, [#allocation15]  }
0x1430   : > { %1743 = dma.done.wait (%p1415_p4), [#allocation7], 16  }
0x1431   : > { %1745 = vsyncadd (%p1415_p4), [#allocation7], 4294967280 }
0x1432   : > { %1747 = dma.done.wait (%p1415_p4), [#allocation15], 32  }
0x1433   : > { %1749 = vsyncadd (%p1415_p4), [#allocation15], 4294967264 }
0x1434 PF: > { %p24_p5 = scmp.ge.s32.totalorder %s1893_s19, 4   ;;  %s2159_s30 = smov %s1756_s10 }
0x1435   : > { %s2160_s10 = smov %s1760_s11  ;;  %s2161_s11 = smov %s1908_s23 }
0x1436   : > { %s2162_s12 = smov %s1893_s19  ;;  %26 = sbr.rel (!%p24_p5) target bundleno = 10 (0xa), region = 117 }
0x143b   :  { %1221 = vsyncpa [#allocation6], 1 }
0x143c   :  { %1223 = vsyncpa [#allocation6 + $0x1], 1 }
0x143d   :  { %1224 = vsyncpa [#allocation9], 1 }
0x143e   :  { %1225 = vsyncpa [#allocation12], 1 }
0x143f   :  { %1226 = vsyncpa [#allocation7], 1 }
0x1440   :  { %1228 = vsyncpa [#allocation7 + $0x1], 1 }
0x1441   :  { %1229 = vsyncpa [#allocation15], 1 }

</bundles_post_ra>
